<compile_context>
chip_gen: v5e
topology: v5e:2x2
jax: 0.10.0
libtpu: 0.0.40
codegen_flags: <defaults>
</compile_context>

<pallas_src>
import functools
import math

import jax
import jax.numpy as jnp
from jax.experimental import pallas as pl
from jax.experimental.pallas import tpu as pltpu


# ----------------------------------------------------------------------------
# Pallas kernel
# ----------------------------------------------------------------------------
def sakt_kernel(xq_ref, xe_ref,
                w_qffn, b_qffn, w_kvffn, b_kvffn,
                w_qlin, b_qlin, w_kv, b_kv,
                w_qin, b_qin, w_op, b_op,
                g1, be1, w_f0, b_f0, w_f1, b_f1,
                g2, be2, w_out, b_out,
                o_ref, *, heads, seq_len):
    rows = xq_ref.shape[0]          # b_tile * S
    S = seq_len
    Bt = rows // S
    D = w_qffn.shape[1]
    Dh = D // heads
    scale = 1.0 / math.sqrt(Dh)

    def mm(x, w):
        return jnp.dot(x, w[...], preferred_element_type=jnp.float32)

    def layer_norm(x, g, b):        # eps matches nn.LayerNorm default
        mu = jnp.mean(x, axis=-1, keepdims=True)
        xc = x - mu
        var = jnp.mean(xc * xc, axis=-1, keepdims=True)
        return xc * jax.lax.rsqrt(var + 1e-5) * g[...] + b[...]

    xq = xq_ref[...]                 # (rows, 5E)  already flattened by wrapper
    xe = xe_ref[...]                 # (rows, 4E)

    # query_ffn / kv_ffn + ReLU
    q_feat = jnp.maximum(mm(xq, w_qffn) + b_qffn[...], 0.0)     # (rows, D)
    kv_feat = jnp.maximum(mm(xe, w_kvffn) + b_kvffn[...], 0.0)  # (rows, D)

    # linear[2] on the query (kept for the residual), then MHA q in-projection
    q_lin = mm(q_feat, w_qlin) + b_qlin[...]
    q_proj = mm(q_lin, w_qin) + b_qin[...]

    # key/value path: linear[1]∘in_proj_k and linear[0]∘in_proj_v were composed
    # offline in the wrapper -> a single (D, 2D) matmul produces K' and V'.
    kv = mm(kv_feat, w_kv) + b_kv[...]                          # (rows, 2D)
    k_proj = kv[:, :D]
    v_proj = kv[:, D:]

    q3 = q_proj.reshape(Bt, S, D)
    k3 = k_proj.reshape(Bt, S, D)
    v3 = v_proj.reshape(Bt, S, D)

    # causal mask (strict upper triangle masked), built once
    q_idx = jax.lax.broadcasted_iota(jnp.int32, (S, S), 0)
    k_idx = jax.lax.broadcasted_iota(jnp.int32, (S, S), 1)
    masked = (k_idx > q_idx)[None, :, :]                        # (1, S, S)

    # multi-head attention: small static head count -> unrolled per-head loop
    ctx_heads = []
    for h in range(heads):
        sl = slice(h * Dh, (h + 1) * Dh)
        s = jnp.einsum('bqd,bkd->bqk', q3[:, :, sl], k3[:, :, sl],
                       preferred_element_type=jnp.float32) * scale
        s = jnp.where(masked, jnp.float32(-1e30), s)
        s = s - jnp.max(s, axis=-1, keepdims=True)
        e = jnp.exp(s)
        a = e / jnp.sum(e, axis=-1, keepdims=True)
        ctx_heads.append(jnp.einsum('bqk,bkd->bqd', a, v3[:, :, sl],
                                    preferred_element_type=jnp.float32))
    ctx = jnp.concatenate(ctx_heads, axis=-1).reshape(rows, D)

    attn_out = mm(ctx, w_op) + b_op[...]                        # MHA out_proj

    # residual + LayerNorm1
    x1 = layer_norm(q_lin + attn_out, g1, be1)

    # FFN (Linear -> ReLU -> Linear), residual + LayerNorm2
    hid = jnp.maximum(mm(x1, w_f0) + b_f0[...], 0.0)
    x2 = layer_norm(mm(hid, w_f1) + b_f1[...] + x1, g2, be2)

    # output linear (D -> 1) as a VPU multiply + lane reduction so the store is
    # a lane-dense (Bt, S) write (no last-dim-1 masked stores).
    logits = jnp.sum(x2.reshape(Bt, S, D) * w_out[...].reshape(1, 1, D),
                     axis=-1) + b_out[...]
    o_ref[...] = jax.nn.sigmoid(logits)


def sakt_pallas(x_qu, x_ex, p, heads):
    B, S, Fq = x_qu.shape
    Fk = x_ex.shape[2]
    D = p["w_qffn"].shape[1]
    assert D % heads == 0

    # batch tile: largest divisor of B that is <= 8 (f32 sublane friendly)
    b_tile = max(t for t in range(1, min(B, 8) + 1) if B % t == 0)
    grid = (B // b_tile,)
    rows = b_tile * S

    # offline composition of linear[1]->in_proj_k and linear[0]->in_proj_v
    w_k = p["w_lin1"] @ p["w_kin"]
    b_k = p["b_lin1"] @ p["w_kin"] + p["b_kin"]
    w_v = p["w_lin0"] @ p["w_vin"]
    b_v = p["b_lin0"] @ p["w_vin"] + p["b_vin"]
    w_kv = jnp.concatenate([w_k, w_v], axis=1)        # (D, 2D)
    b_kv = jnp.concatenate([b_k, b_v], axis=1)        # (1, 2D)

    # layout plumbing in the wrapper (free), not in the kernel
    xq2 = x_qu.reshape(B * S, Fq)
    xe2 = x_ex.reshape(B * S, Fk)

    weights = [p["w_qffn"], p["b_qffn"], p["w_kvffn"], p["b_kvffn"],
               p["w_lin2"], p["b_lin2"], w_kv, b_kv,
               p["w_qin"], p["b_qin"], p["w_oproj"], p["b_oproj"],
               p["g1"], p["be1"], p["w_f0"], p["b_f0"],
               p["w_f1"], p["b_f1"], p["g2"], p["be2"],
               p["w_lout"], p["b_lout"]]
    wspec = lambda w: pl.BlockSpec(w.shape, lambda b: (0, 0))   # resident

    # TODO(synk): for v6e/v7x, weights/activations could be stored bf16 with
    # f32 accumulation; kept f32 here for bit-level closeness to the reference.
    out = pl.pallas_call(
        functools.partial(sakt_kernel, heads=heads, seq_len=S),
        out_shape=jax.ShapeDtypeStruct((B, S), jnp.float32),
        grid_spec=pltpu.PrefetchScalarGridSpec(
            num_scalar_prefetch=0,
            grid=grid,
            in_specs=[pl.BlockSpec((rows, Fq), lambda b: (b, 0)),
                      pl.BlockSpec((rows, Fk), lambda b: (b, 0))]
                     + [wspec(w) for w in weights],
            out_specs=pl.BlockSpec((b_tile, S), lambda b: (b, 0))),
        compiler_params=pltpu.CompilerParams(
            dimension_semantics=("parallel",)),
    )(xq2, xe2, *weights)
    return out[..., None]                              # (B, S, 1) like PyTorch


# ----------------------------------------------------------------------------
# Parameter construction (deterministic) + JAX-side glue (embeds / PE / concat)
# ----------------------------------------------------------------------------
def make_params(key, *, dim, ex_total, cat_total, seq_len):
    D = E = dim
    ks = iter(jax.random.split(key, 48))
    u = lambda shape, s: jax.random.uniform(next(ks), shape, jnp.float32, -s, s)
    sD = 1.0 / math.sqrt(D)
    s5 = 1.0 / math.sqrt(5 * E)
    s4 = 1.0 / math.sqrt(4 * E)
    p = {
        "emb_ex":      jax.random.normal(next(ks), (ex_total, E), jnp.float32),
        "emb_cat":     jax.random.normal(next(ks), (cat_total, E), jnp.float32),
        "emb_correct": jax.random.normal(next(ks), (3, E), jnp.float32),
        # scalar feature Linear(1, E): stored (1, E) weight + (1, E) bias
        "w_el": u((1, E), 1.0), "b_el": u((1, E), 1.0),
        "w_ts": u((1, E), 1.0), "b_ts": u((1, E), 1.0),
        "w_me": u((1, E), 1.0), "b_me": u((1, E), 1.0),
        "w_mc": u((1, E), 1.0), "b_mc": u((1, E), 1.0),
        # query_ffn / kv_ffn
        "w_qffn": u((5 * E, D), s5), "b_qffn": u((1, D), s5),
        "w_kvffn": u((4 * E, D), s4), "b_kvffn": u((1, D), s4),
        # linear[0..2]
        "w_lin0": u((D, D), sD), "b_lin0": u((1, D), sD),
        "w_lin1": u((D, D), sD), "b_lin1": u((1, D), sD),
        "w_lin2": u((D, D), sD), "b_lin2": u((1, D), sD),
        # MultiheadAttention in/out projections
        "w_qin": u((D, D), sD), "b_qin": u((1, D), sD),
        "w_kin": u((D, D), sD), "b_kin": u((1, D), sD),
        "w_vin": u((D, D), sD), "b_vin": u((1, D), sD),
        "w_oproj": u((D, D), sD), "b_oproj": u((1, D), sD),
        # layer norms (randomized affine so the test exercises them)
        "g1": 1.0 + u((1, D), 0.1), "be1": u((1, D), 0.1),
        # ffn[0..1]
        "w_f0": u((D, D), sD), "b_f0": u((1, D), sD),
        "w_f1": u((D, D), sD), "b_f1": u((1, D), sD),
        "g2": 1.0 + u((1, D), 0.1), "be2": u((1, D), 0.1),
        # linear_out, stored as a (1, D) row for a lane-dense output reduce
        "w_lout": u((1, D), sD), "b_lout": u((1, 1), sD),
    }
    # sinusoidal positional encoding buffer (max_len = seq_len), then the
    # module's pe[:, :seq_len] slice (valid feature concat needs seq_len >= dim)
    pos = jnp.arange(seq_len, dtype=jnp.float32)[:, None]
    div = jnp.exp(jnp.arange(0, E, 2, dtype=jnp.float32)
                  * (-math.log(10000.0) / E))
    pe = jnp.zeros((seq_len, E), jnp.float32)
    pe = pe.at[:, 0::2].set(jnp.sin(pos * div))
    pe = pe.at[:, 1::2].set(jnp.cos(pos * div))
    p["pe"] = pe[:, :seq_len] if seq_len < E else pe
    return p


def build_features(p, in_id, in_cat, in_in, in_elapsed, in_ts, in_me, in_mc):
    """Embedding gathers + scalar Linear(1,E) embeds + concat.  Concat order
    matches the PyTorch forward: query = [id, cat, mean_elapsed, mean_correct,
    pos]; key/value = [past_correctness, elapsed, timestamp, pos]."""
    B, S = in_id.shape
    E = p["emb_ex"].shape[1]
    e_id = p["emb_ex"][in_id]
    e_cat = p["emb_cat"][in_cat]
    e_in = p["emb_correct"][in_in]
    e_pos = jnp.broadcast_to(p["pe"][None], (B, S, E))
    lin = lambda x, w, b: x * w[0][None, None, :] + b[0][None, None, :]
    e_el = lin(in_elapsed, p["w_el"], p["b_el"])
    e_ts = lin(in_ts, p["w_ts"], p["b_ts"])
    e_me = lin(in_me, p["w_me"], p["b_me"])
    e_mc = lin(in_mc, p["w_mc"], p["b_mc"])
    x_qu = jnp.concatenate([e_id, e_cat, e_me, e_mc, e_pos], axis=2)   # 5E
    x_ex = jnp.concatenate([e_in, e_el, e_ts, e_pos], axis=2)          # 4E
    return x_qu, x_ex


# ----------------------------------------------------------------------------
# Pure-JAX reference (uncomposed weights, matches PyTorch forward)
# ----------------------------------------------------------------------------
def sakt_reference(x_qu, x_ex, p, heads):
    B, S, _ = x_qu.shape
    D = p["w_qffn"].shape[1]
    Dh = D // heads

    def ln(x, g, b):
        mu = jnp.mean(x, -1, keepdims=True)
        var = jnp.mean((x - mu) ** 2, -1, keepdims=True)
        return (x - mu) / jnp.sqrt(var + 1e-5) * g + b

    q_feat = jnp.maximum(x_qu @ p["w_qffn"] + p["b_qffn"], 0.0)
    kv_feat = jnp.maximum(x_ex @ p["w_kvffn"] + p["b_kvffn"], 0.0)
    v_lin = kv_feat @ p["w_lin0"] + p["b_lin0"]
    k_lin = kv_feat @ p["w_lin1"] + p["b_lin1"]
    q_lin = q_feat @ p["w_lin2"] + p["b_lin2"]
    q = q_lin @ p["w_qin"] + p["b_qin"]
    k = k_lin @ p["w_kin"] + p["b_kin"]
    v = v_lin @ p["w_vin"] + p["b_vin"]
    qh = q.reshape(B, S, heads, Dh).transpose(0, 2, 1, 3)
    kh = k.reshape(B, S, heads, Dh).transpose(0, 2, 1, 3)
    vh = v.reshape(B, S, heads, Dh).transpose(0, 2, 1, 3)
    scores = jnp.einsum('bhqd,bhkd->bhqk', qh, kh) / math.sqrt(Dh)
    mask = jnp.triu(jnp.ones((S, S), bool), k=1)
    scores = jnp.where(mask[None, None], -1e30, scores)
    attn = jax.nn.softmax(scores, axis=-1)
    ctx = jnp.einsum('bhqk,bhkd->bhqd', attn, vh)
    ctx = ctx.transpose(0, 2, 1, 3).reshape(B, S, D)
    attn_out = ctx @ p["w_oproj"] + p["b_oproj"]
    x1 = ln(q_lin + attn_out, p["g1"], p["be1"])
    hid = jnp.maximum(x1 @ p["w_f0"] + p["b_f0"], 0.0)
    x2 = ln(hid @ p["w_f1"] + p["b_f1"] + x1, p["g2"], p["be2"])
    return jax.nn.sigmoid(x2 @ p["w_lout"].T + p["b_lout"][0])


# ----------------------------------------------------------------------------
if __name__ == "__main__":
    B, S, dim, heads = 2, 16, 16, 2          # seq_len >= dim (PE slice quirk)
    ex_total, cat_total = 20, 10

    key = jax.random.PRNGKey(0)
    kp, k1, k2, k3, k4, k5, k6, k7 = jax.random.split(key, 8)

    params = make_params(kp, dim=dim, ex_total=ex_total,
                         cat_total=cat_total, seq_len=S)

    in_id = jax.random.randint(k1, (B, S), 1, ex_total)
    in_cat = jax.random.randint(k2, (B, S), 0, cat_total)
    in_in = jax.random.randint(k3, (B, S), 0, 3)
    in_elapsed = jax.random.uniform(k4, (B, S, 1), jnp.float32)
    in_ts = jax.random.uniform(k5, (B, S, 1), jnp.float32)
    in_me = jax.random.uniform(k6, (B, S, 1), jnp.float32)
    in_mc = jax.random.uniform(k7, (B, S, 1), jnp.float32)

    x_qu, x_ex = build_features(params, in_id, in_cat, in_in,
                                in_elapsed, in_ts, in_me, in_mc)

    out = sakt_pallas(x_qu, x_ex, params, heads=heads)
    jax.block_until_ready(out)

    ref = sakt_reference(x_qu, x_ex, params, heads=heads)
    assert out.shape == (B, S, 1), out.shape
    err = float(jnp.max(jnp.abs(out - ref)))
    assert jnp.allclose(out, ref, rtol=1e-4, atol=1e-5), (
        f"kernel/reference mismatch: max abs err {err}")

    print("KERNEL_OK")
</pallas_src>

<mosaic_0001>
module attributes {stable_mosaic.version = 11 : i64} {
  func.func @sakt_kernel(%arg0: i32, %arg1: memref<32x80xf32, #tpu.memory_space<vmem>>, %arg2: memref<32x64xf32, #tpu.memory_space<vmem>>, %arg3: memref<80x16xf32, #tpu.memory_space<vmem>>, %arg4: memref<1x16xf32, #tpu.memory_space<vmem>>, %arg5: memref<64x16xf32, #tpu.memory_space<vmem>>, %arg6: memref<1x16xf32, #tpu.memory_space<vmem>>, %arg7: memref<16x16xf32, #tpu.memory_space<vmem>>, %arg8: memref<1x16xf32, #tpu.memory_space<vmem>>, %arg9: memref<16x32xf32, #tpu.memory_space<vmem>>, %arg10: memref<1x32xf32, #tpu.memory_space<vmem>>, %arg11: memref<16x16xf32, #tpu.memory_space<vmem>>, %arg12: memref<1x16xf32, #tpu.memory_space<vmem>>, %arg13: memref<16x16xf32, #tpu.memory_space<vmem>>, %arg14: memref<1x16xf32, #tpu.memory_space<vmem>>, %arg15: memref<1x16xf32, #tpu.memory_space<vmem>>, %arg16: memref<1x16xf32, #tpu.memory_space<vmem>>, %arg17: memref<16x16xf32, #tpu.memory_space<vmem>>, %arg18: memref<1x16xf32, #tpu.memory_space<vmem>>, %arg19: memref<16x16xf32, #tpu.memory_space<vmem>>, %arg20: memref<1x16xf32, #tpu.memory_space<vmem>>, %arg21: memref<1x16xf32, #tpu.memory_space<vmem>>, %arg22: memref<1x16xf32, #tpu.memory_space<vmem>>, %arg23: memref<1x16xf32, #tpu.memory_space<vmem>>, %arg24: memref<1x1xf32, #tpu.memory_space<vmem>>, %arg25: memref<2x16xf32, #tpu.memory_space<vmem>>) attributes {dimension_semantics = [#tpu.dimension_semantics<parallel>], iteration_bounds = array<i64: 1>, scalar_prefetch = 0 : i64, scratch_operands = 0 : i64, tpu.core_type = #tpu.core_type<tc>, window_params = [{transform_indices = @transform_0, window_bounds = array<i64: 32, 80>}, {transform_indices = @transform_1, window_bounds = array<i64: 32, 64>}, {pipeline_mode = #tpu.pipeline_mode<synchronous>, transform_indices = @transform_2, window_bounds = array<i64: 80, 16>}, {pipeline_mode = #tpu.pipeline_mode<synchronous>, transform_indices = @transform_3, window_bounds = array<i64: 1, 16>}, {pipeline_mode = #tpu.pipeline_mode<synchronous>, transform_indices = @transform_4, window_bounds = array<i64: 64, 16>}, {pipeline_mode = #tpu.pipeline_mode<synchronous>, transform_indices = @transform_5, window_bounds = array<i64: 1, 16>}, {pipeline_mode = #tpu.pipeline_mode<synchronous>, transform_indices = @transform_6, window_bounds = array<i64: 16, 16>}, {pipeline_mode = #tpu.pipeline_mode<synchronous>, transform_indices = @transform_7, window_bounds = array<i64: 1, 16>}, {pipeline_mode = #tpu.pipeline_mode<synchronous>, transform_indices = @transform_8, window_bounds = array<i64: 16, 32>}, {pipeline_mode = #tpu.pipeline_mode<synchronous>, transform_indices = @transform_9, window_bounds = array<i64: 1, 32>}, {pipeline_mode = #tpu.pipeline_mode<synchronous>, transform_indices = @transform_10, window_bounds = array<i64: 16, 16>}, {pipeline_mode = #tpu.pipeline_mode<synchronous>, transform_indices = @transform_11, window_bounds = array<i64: 1, 16>}, {pipeline_mode = #tpu.pipeline_mode<synchronous>, transform_indices = @transform_12, window_bounds = array<i64: 16, 16>}, {pipeline_mode = #tpu.pipeline_mode<synchronous>, transform_indices = @transform_13, window_bounds = array<i64: 1, 16>}, {pipeline_mode = #tpu.pipeline_mode<synchronous>, transform_indices = @transform_14, window_bounds = array<i64: 1, 16>}, {pipeline_mode = #tpu.pipeline_mode<synchronous>, transform_indices = @transform_15, window_bounds = array<i64: 1, 16>}, {pipeline_mode = #tpu.pipeline_mode<synchronous>, transform_indices = @transform_16, window_bounds = array<i64: 16, 16>}, {pipeline_mode = #tpu.pipeline_mode<synchronous>, transform_indices = @transform_17, window_bounds = array<i64: 1, 16>}, {pipeline_mode = #tpu.pipeline_mode<synchronous>, transform_indices = @transform_18, window_bounds = array<i64: 16, 16>}, {pipeline_mode = #tpu.pipeline_mode<synchronous>, transform_indices = @transform_19, window_bounds = array<i64: 1, 16>}, {pipeline_mode = #tpu.pipeline_mode<synchronous>, transform_indices = @transform_20, window_bounds = array<i64: 1, 16>}, {pipeline_mode = #tpu.pipeline_mode<synchronous>, transform_indices = @transform_21, window_bounds = array<i64: 1, 16>}, {pipeline_mode = #tpu.pipeline_mode<synchronous>, transform_indices = @transform_22, window_bounds = array<i64: 1, 16>}, {pipeline_mode = #tpu.pipeline_mode<synchronous>, transform_indices = @transform_23, window_bounds = array<i64: 1, 1>}, {transform_indices = @transform_24, window_bounds = array<i64: 2, 16>}]} {
    %c0 = arith.constant 0 : index
    %c0_0 = arith.constant 0 : index
    %0 = vector.load %arg1[%c0, %c0_0] : memref<32x80xf32, #tpu.memory_space<vmem>>, vector<32x80xf32>
    %c0_1 = arith.constant 0 : index
    %c0_2 = arith.constant 0 : index
    %1 = vector.load %arg2[%c0_1, %c0_2] : memref<32x64xf32, #tpu.memory_space<vmem>>, vector<32x64xf32>
    %c0_3 = arith.constant 0 : index
    %c0_4 = arith.constant 0 : index
    %2 = vector.load %arg3[%c0_3, %c0_4] : memref<80x16xf32, #tpu.memory_space<vmem>>, vector<80x16xf32>
    %cst = arith.constant dense<0.000000e+00> : vector<32x16xf32>
    %3 = tpu.matmul %0, %2, %cst {dimension_numbers = #tpu.dot_dimension_numbers<[1], [0], [0], [1], [0, 0, 1, 1], [], []>} : vector<32x80xf32>, vector<80x16xf32>, vector<32x16xf32> -> vector<32x16xf32>
    %c0_5 = arith.constant 0 : index
    %c0_6 = arith.constant 0 : index
    %4 = vector.load %arg4[%c0_5, %c0_6] : memref<1x16xf32, #tpu.memory_space<vmem>>, vector<1x16xf32>
    %5 = vector.broadcast %4 : vector<1x16xf32> to vector<32x16xf32>
    %6 = arith.addf %3, %5 : vector<32x16xf32>
    %cst_7 = arith.constant 0.000000e+00 : f32
    %7 = vector.broadcast %cst_7 : f32 to vector<32x16xf32>
    %8 = arith.maximumf %6, %7 : vector<32x16xf32>
    %c0_8 = arith.constant 0 : index
    %c0_9 = arith.constant 0 : index
    %9 = vector.load %arg5[%c0_8, %c0_9] : memref<64x16xf32, #tpu.memory_space<vmem>>, vector<64x16xf32>
    %cst_10 = arith.constant dense<0.000000e+00> : vector<32x16xf32>
    %10 = tpu.matmul %1, %9, %cst_10 {dimension_numbers = #tpu.dot_dimension_numbers<[1], [0], [0], [1], [0, 0, 1, 1], [], []>} : vector<32x64xf32>, vector<64x16xf32>, vector<32x16xf32> -> vector<32x16xf32>
    %c0_11 = arith.constant 0 : index
    %c0_12 = arith.constant 0 : index
    %11 = vector.load %arg6[%c0_11, %c0_12] : memref<1x16xf32, #tpu.memory_space<vmem>>, vector<1x16xf32>
    %12 = vector.broadcast %11 : vector<1x16xf32> to vector<32x16xf32>
    %13 = arith.addf %10, %12 : vector<32x16xf32>
    %cst_13 = arith.constant 0.000000e+00 : f32
    %14 = vector.broadcast %cst_13 : f32 to vector<32x16xf32>
    %15 = arith.maximumf %13, %14 : vector<32x16xf32>
    %c0_14 = arith.constant 0 : index
    %c0_15 = arith.constant 0 : index
    %16 = vector.load %arg7[%c0_14, %c0_15] : memref<16x16xf32, #tpu.memory_space<vmem>>, vector<16x16xf32>
    %cst_16 = arith.constant dense<0.000000e+00> : vector<32x16xf32>
    %17 = tpu.matmul %8, %16, %cst_16 {dimension_numbers = #tpu.dot_dimension_numbers<[1], [0], [0], [1], [0, 0, 1, 1], [], []>} : vector<32x16xf32>, vector<16x16xf32>, vector<32x16xf32> -> vector<32x16xf32>
    %c0_17 = arith.constant 0 : index
    %c0_18 = arith.constant 0 : index
    %18 = vector.load %arg8[%c0_17, %c0_18] : memref<1x16xf32, #tpu.memory_space<vmem>>, vector<1x16xf32>
    %19 = vector.broadcast %18 : vector<1x16xf32> to vector<32x16xf32>
    %20 = arith.addf %17, %19 : vector<32x16xf32>
    %c0_19 = arith.constant 0 : index
    %c0_20 = arith.constant 0 : index
    %21 = vector.load %arg11[%c0_19, %c0_20] : memref<16x16xf32, #tpu.memory_space<vmem>>, vector<16x16xf32>
    %cst_21 = arith.constant dense<0.000000e+00> : vector<32x16xf32>
    %22 = tpu.matmul %20, %21, %cst_21 {dimension_numbers = #tpu.dot_dimension_numbers<[1], [0], [0], [1], [0, 0, 1, 1], [], []>} : vector<32x16xf32>, vector<16x16xf32>, vector<32x16xf32> -> vector<32x16xf32>
    %c0_22 = arith.constant 0 : index
    %c0_23 = arith.constant 0 : index
    %23 = vector.load %arg12[%c0_22, %c0_23] : memref<1x16xf32, #tpu.memory_space<vmem>>, vector<1x16xf32>
    %24 = vector.broadcast %23 : vector<1x16xf32> to vector<32x16xf32>
    %25 = arith.addf %22, %24 : vector<32x16xf32>
    %c0_24 = arith.constant 0 : index
    %c0_25 = arith.constant 0 : index
    %26 = vector.load %arg9[%c0_24, %c0_25] : memref<16x32xf32, #tpu.memory_space<vmem>>, vector<16x32xf32>
    %cst_26 = arith.constant dense<0.000000e+00> : vector<32x32xf32>
    %27 = tpu.matmul %15, %26, %cst_26 {dimension_numbers = #tpu.dot_dimension_numbers<[1], [0], [0], [1], [0, 0, 1, 1], [], []>} : vector<32x16xf32>, vector<16x32xf32>, vector<32x32xf32> -> vector<32x32xf32>
    %c0_27 = arith.constant 0 : index
    %c0_28 = arith.constant 0 : index
    %28 = vector.load %arg10[%c0_27, %c0_28] : memref<1x32xf32, #tpu.memory_space<vmem>>, vector<1x32xf32>
    %29 = vector.broadcast %28 : vector<1x32xf32> to vector<32x32xf32>
    %30 = arith.addf %27, %29 : vector<32x32xf32>
    %31 = vector.extract_strided_slice %30 {offsets = [0, 0], sizes = [32, 16], strides = [1, 1]} : vector<32x32xf32> to vector<32x16xf32>
    %32 = vector.extract_strided_slice %30 {offsets = [0, 16], sizes = [32, 16], strides = [1, 1]} : vector<32x32xf32> to vector<32x16xf32>
    %33 = vector.shape_cast %25 : vector<32x16xf32> to vector<2x16x16xf32>
    %34 = vector.shape_cast %31 : vector<32x16xf32> to vector<2x16x16xf32>
    %35 = vector.shape_cast %32 : vector<32x16xf32> to vector<2x16x16xf32>
    %36 = tpu.iota {dimensions = array<i32: 0>} : vector<16x16xi32>
    %37 = tpu.iota {dimensions = array<i32: 1>} : vector<16x16xi32>
    %38 = arith.cmpi sgt, %37, %36 : vector<16x16xi32>
    %39 = vector.shape_cast %38 : vector<16x16xi1> to vector<1x16x16xi1>
    %40 = vector.extract_strided_slice %33 {offsets = [0, 0, 0], sizes = [2, 16, 8], strides = [1, 1, 1]} : vector<2x16x16xf32> to vector<2x16x8xf32>
    %41 = vector.extract_strided_slice %34 {offsets = [0, 0, 0], sizes = [2, 16, 8], strides = [1, 1, 1]} : vector<2x16x16xf32> to vector<2x16x8xf32>
    "tpu.trace_start"() <{level = 10 : i32, message = "bqd,bkd->bqk"}> : () -> ()
    %cst_29 = arith.constant dense<0.000000e+00> : vector<2x16x16xf32>
    %42 = tpu.matmul %40, %41, %cst_29 {dimension_numbers = #tpu.dot_dimension_numbers<[2], [2], [1], [1], [0, 0, 0, 1, 1, 1], [0], [0]>} : vector<2x16x8xf32>, vector<2x16x8xf32>, vector<2x16x16xf32> -> vector<2x16x16xf32>
    "tpu.trace_stop"() : () -> ()
    %cst_30 = arith.constant 0.353553385 : f32
    %43 = vector.broadcast %cst_30 : f32 to vector<2x16x16xf32>
    %44 = arith.mulf %42, %43 : vector<2x16x16xf32>
    %cst_31 = arith.constant -1.000000e+30 : f32
    %45 = vector.shape_cast %39 : vector<1x16x16xi1> to vector<1x16x16xi1>
    %46 = vector.broadcast %45 : vector<1x16x16xi1> to vector<2x16x16xi1>
    %47 = vector.broadcast %cst_31 : f32 to vector<2x16x16xf32>
    %48 = arith.select %46, %47, %44 : vector<2x16x16xi1>, vector<2x16x16xf32>
    %cst_32 = arith.constant dense<0xFF800000> : vector<2x16xf32>
    %49 = vector.multi_reduction <maximumf>, %48, %cst_32 [2] : vector<2x16x16xf32> to vector<2x16xf32>
    %50 = vector.shape_cast %49 : vector<2x16xf32> to vector<2x16x1xf32>
    %51 = vector.broadcast %50 : vector<2x16x1xf32> to vector<2x16x16xf32>
    %52 = arith.subf %48, %51 : vector<2x16x16xf32>
    %53 = math.exp %52 : vector<2x16x16xf32>
    %cst_33 = arith.constant dense<0.000000e+00> : vector<2x16xf32>
    %54 = vector.multi_reduction <add>, %53, %cst_33 [2] : vector<2x16x16xf32> to vector<2x16xf32>
    %55 = vector.shape_cast %54 : vector<2x16xf32> to vector<2x16x1xf32>
    %56 = vector.broadcast %55 : vector<2x16x1xf32> to vector<2x16x16xf32>
    %57 = arith.divf %53, %56 : vector<2x16x16xf32>
    %58 = vector.extract_strided_slice %35 {offsets = [0, 0, 0], sizes = [2, 16, 8], strides = [1, 1, 1]} : vector<2x16x16xf32> to vector<2x16x8xf32>
    "tpu.trace_start"() <{level = 10 : i32, message = "bqk,bkd->bqd"}> : () -> ()
    %cst_34 = arith.constant dense<0.000000e+00> : vector<2x16x8xf32>
    %59 = tpu.matmul %57, %58, %cst_34 {dimension_numbers = #tpu.dot_dimension_numbers<[2], [1], [1], [2], [0, 0, 0, 1, 1, 2], [0], [0]>} : vector<2x16x16xf32>, vector<2x16x8xf32>, vector<2x16x8xf32> -> vector<2x16x8xf32>
    "tpu.trace_stop"() : () -> ()
    %60 = vector.extract_strided_slice %33 {offsets = [0, 0, 8], sizes = [2, 16, 8], strides = [1, 1, 1]} : vector<2x16x16xf32> to vector<2x16x8xf32>
    %61 = vector.extract_strided_slice %34 {offsets = [0, 0, 8], sizes = [2, 16, 8], strides = [1, 1, 1]} : vector<2x16x16xf32> to vector<2x16x8xf32>
    "tpu.trace_start"() <{level = 10 : i32, message = "bqd,bkd->bqk"}> : () -> ()
    %cst_35 = arith.constant dense<0.000000e+00> : vector<2x16x16xf32>
    %62 = tpu.matmul %60, %61, %cst_35 {dimension_numbers = #tpu.dot_dimension_numbers<[2], [2], [1], [1], [0, 0, 0, 1, 1, 1], [0], [0]>} : vector<2x16x8xf32>, vector<2x16x8xf32>, vector<2x16x16xf32> -> vector<2x16x16xf32>
    "tpu.trace_stop"() : () -> ()
    %cst_36 = arith.constant 0.353553385 : f32
    %63 = vector.broadcast %cst_36 : f32 to vector<2x16x16xf32>
    %64 = arith.mulf %62, %63 : vector<2x16x16xf32>
    %cst_37 = arith.constant -1.000000e+30 : f32
    %65 = vector.shape_cast %39 : vector<1x16x16xi1> to vector<1x16x16xi1>
    %66 = vector.broadcast %65 : vector<1x16x16xi1> to vector<2x16x16xi1>
    %67 = vector.broadcast %cst_37 : f32 to vector<2x16x16xf32>
    %68 = arith.select %66, %67, %64 : vector<2x16x16xi1>, vector<2x16x16xf32>
    %cst_38 = arith.constant dense<0xFF800000> : vector<2x16xf32>
    %69 = vector.multi_reduction <maximumf>, %68, %cst_38 [2] : vector<2x16x16xf32> to vector<2x16xf32>
    %70 = vector.shape_cast %69 : vector<2x16xf32> to vector<2x16x1xf32>
    %71 = vector.broadcast %70 : vector<2x16x1xf32> to vector<2x16x16xf32>
    %72 = arith.subf %68, %71 : vector<2x16x16xf32>
    %73 = math.exp %72 : vector<2x16x16xf32>
    %cst_39 = arith.constant dense<0.000000e+00> : vector<2x16xf32>
    %74 = vector.multi_reduction <add>, %73, %cst_39 [2] : vector<2x16x16xf32> to vector<2x16xf32>
    %75 = vector.shape_cast %74 : vector<2x16xf32> to vector<2x16x1xf32>
    %76 = vector.broadcast %75 : vector<2x16x1xf32> to vector<2x16x16xf32>
    %77 = arith.divf %73, %76 : vector<2x16x16xf32>
    %78 = vector.extract_strided_slice %35 {offsets = [0, 0, 8], sizes = [2, 16, 8], strides = [1, 1, 1]} : vector<2x16x16xf32> to vector<2x16x8xf32>
    "tpu.trace_start"() <{level = 10 : i32, message = "bqk,bkd->bqd"}> : () -> ()
    %cst_40 = arith.constant dense<0.000000e+00> : vector<2x16x8xf32>
    %79 = tpu.matmul %77, %78, %cst_40 {dimension_numbers = #tpu.dot_dimension_numbers<[2], [1], [1], [2], [0, 0, 0, 1, 1, 2], [0], [0]>} : vector<2x16x16xf32>, vector<2x16x8xf32>, vector<2x16x8xf32> -> vector<2x16x8xf32>
    "tpu.trace_stop"() : () -> ()
    %80 = tpu.concatenate %59, %79 in 2 : vector<2x16x8xf32>, vector<2x16x8xf32> -> vector<2x16x16xf32>
    %81 = vector.shape_cast %80 : vector<2x16x16xf32> to vector<32x16xf32>
    %c0_41 = arith.constant 0 : index
    %c0_42 = arith.constant 0 : index
    %82 = vector.load %arg13[%c0_41, %c0_42] : memref<16x16xf32, #tpu.memory_space<vmem>>, vector<16x16xf32>
    %cst_43 = arith.constant dense<0.000000e+00> : vector<32x16xf32>
    %83 = tpu.matmul %81, %82, %cst_43 {dimension_numbers = #tpu.dot_dimension_numbers<[1], [0], [0], [1], [0, 0, 1, 1], [], []>} : vector<32x16xf32>, vector<16x16xf32>, vector<32x16xf32> -> vector<32x16xf32>
    %c0_44 = arith.constant 0 : index
    %c0_45 = arith.constant 0 : index
    %84 = vector.load %arg14[%c0_44, %c0_45] : memref<1x16xf32, #tpu.memory_space<vmem>>, vector<1x16xf32>
    %85 = vector.broadcast %84 : vector<1x16xf32> to vector<32x16xf32>
    %86 = arith.addf %83, %85 : vector<32x16xf32>
    %87 = arith.addf %20, %86 : vector<32x16xf32>
    %cst_46 = arith.constant dense<0.000000e+00> : vector<32xf32>
    %88 = vector.multi_reduction <add>, %87, %cst_46 [1] : vector<32x16xf32> to vector<32xf32>
    %89 = vector.shape_cast %88 : vector<32xf32> to vector<32x1xf32>
    %cst_47 = arith.constant 1.600000e+01 : f32
    %90 = vector.broadcast %cst_47 : f32 to vector<32x1xf32>
    %91 = arith.divf %89, %90 : vector<32x1xf32>
    %92 = vector.broadcast %91 : vector<32x1xf32> to vector<32x16xf32>
    %93 = arith.subf %87, %92 : vector<32x16xf32>
    %94 = arith.mulf %93, %93 : vector<32x16xf32>
    %cst_48 = arith.constant dense<0.000000e+00> : vector<32xf32>
    %95 = vector.multi_reduction <add>, %94, %cst_48 [1] : vector<32x16xf32> to vector<32xf32>
    %96 = vector.shape_cast %95 : vector<32xf32> to vector<32x1xf32>
    %cst_49 = arith.constant 1.600000e+01 : f32
    %97 = vector.broadcast %cst_49 : f32 to vector<32x1xf32>
    %98 = arith.divf %96, %97 : vector<32x1xf32>
    %cst_50 = arith.constant 9.99999974E-6 : f32
    %99 = vector.broadcast %cst_50 : f32 to vector<32x1xf32>
    %100 = arith.addf %98, %99 : vector<32x1xf32>
    %101 = math.rsqrt %100 : vector<32x1xf32>
    %102 = vector.broadcast %101 : vector<32x1xf32> to vector<32x16xf32>
    %103 = arith.mulf %93, %102 : vector<32x16xf32>
    %c0_51 = arith.constant 0 : index
    %c0_52 = arith.constant 0 : index
    %104 = vector.load %arg15[%c0_51, %c0_52] : memref<1x16xf32, #tpu.memory_space<vmem>>, vector<1x16xf32>
    %105 = vector.broadcast %104 : vector<1x16xf32> to vector<32x16xf32>
    %106 = arith.mulf %103, %105 : vector<32x16xf32>
    %c0_53 = arith.constant 0 : index
    %c0_54 = arith.constant 0 : index
    %107 = vector.load %arg16[%c0_53, %c0_54] : memref<1x16xf32, #tpu.memory_space<vmem>>, vector<1x16xf32>
    %108 = vector.broadcast %107 : vector<1x16xf32> to vector<32x16xf32>
    %109 = arith.addf %106, %108 : vector<32x16xf32>
    %c0_55 = arith.constant 0 : index
    %c0_56 = arith.constant 0 : index
    %110 = vector.load %arg17[%c0_55, %c0_56] : memref<16x16xf32, #tpu.memory_space<vmem>>, vector<16x16xf32>
    %cst_57 = arith.constant dense<0.000000e+00> : vector<32x16xf32>
    %111 = tpu.matmul %109, %110, %cst_57 {dimension_numbers = #tpu.dot_dimension_numbers<[1], [0], [0], [1], [0, 0, 1, 1], [], []>} : vector<32x16xf32>, vector<16x16xf32>, vector<32x16xf32> -> vector<32x16xf32>
    %c0_58 = arith.constant 0 : index
    %c0_59 = arith.constant 0 : index
    %112 = vector.load %arg18[%c0_58, %c0_59] : memref<1x16xf32, #tpu.memory_space<vmem>>, vector<1x16xf32>
    %113 = vector.broadcast %112 : vector<1x16xf32> to vector<32x16xf32>
    %114 = arith.addf %111, %113 : vector<32x16xf32>
    %cst_60 = arith.constant 0.000000e+00 : f32
    %115 = vector.broadcast %cst_60 : f32 to vector<32x16xf32>
    %116 = arith.maximumf %114, %115 : vector<32x16xf32>
    %c0_61 = arith.constant 0 : index
    %c0_62 = arith.constant 0 : index
    %117 = vector.load %arg19[%c0_61, %c0_62] : memref<16x16xf32, #tpu.memory_space<vmem>>, vector<16x16xf32>
    %cst_63 = arith.constant dense<0.000000e+00> : vector<32x16xf32>
    %118 = tpu.matmul %116, %117, %cst_63 {dimension_numbers = #tpu.dot_dimension_numbers<[1], [0], [0], [1], [0, 0, 1, 1], [], []>} : vector<32x16xf32>, vector<16x16xf32>, vector<32x16xf32> -> vector<32x16xf32>
    %c0_64 = arith.constant 0 : index
    %c0_65 = arith.constant 0 : index
    %119 = vector.load %arg20[%c0_64, %c0_65] : memref<1x16xf32, #tpu.memory_space<vmem>>, vector<1x16xf32>
    %120 = vector.broadcast %119 : vector<1x16xf32> to vector<32x16xf32>
    %121 = arith.addf %118, %120 : vector<32x16xf32>
    %122 = arith.addf %121, %109 : vector<32x16xf32>
    %cst_66 = arith.constant dense<0.000000e+00> : vector<32xf32>
    %123 = vector.multi_reduction <add>, %122, %cst_66 [1] : vector<32x16xf32> to vector<32xf32>
    %124 = vector.shape_cast %123 : vector<32xf32> to vector<32x1xf32>
    %cst_67 = arith.constant 1.600000e+01 : f32
    %125 = vector.broadcast %cst_67 : f32 to vector<32x1xf32>
    %126 = arith.divf %124, %125 : vector<32x1xf32>
    %127 = vector.broadcast %126 : vector<32x1xf32> to vector<32x16xf32>
    %128 = arith.subf %122, %127 : vector<32x16xf32>
    %129 = arith.mulf %128, %128 : vector<32x16xf32>
    %cst_68 = arith.constant dense<0.000000e+00> : vector<32xf32>
    %130 = vector.multi_reduction <add>, %129, %cst_68 [1] : vector<32x16xf32> to vector<32xf32>
    %131 = vector.shape_cast %130 : vector<32xf32> to vector<32x1xf32>
    %cst_69 = arith.constant 1.600000e+01 : f32
    %132 = vector.broadcast %cst_69 : f32 to vector<32x1xf32>
    %133 = arith.divf %131, %132 : vector<32x1xf32>
    %cst_70 = arith.constant 9.99999974E-6 : f32
    %134 = vector.broadcast %cst_70 : f32 to vector<32x1xf32>
    %135 = arith.addf %133, %134 : vector<32x1xf32>
    %136 = math.rsqrt %135 : vector<32x1xf32>
    %137 = vector.broadcast %136 : vector<32x1xf32> to vector<32x16xf32>
    %138 = arith.mulf %128, %137 : vector<32x16xf32>
    %c0_71 = arith.constant 0 : index
    %c0_72 = arith.constant 0 : index
    %139 = vector.load %arg21[%c0_71, %c0_72] : memref<1x16xf32, #tpu.memory_space<vmem>>, vector<1x16xf32>
    %140 = vector.broadcast %139 : vector<1x16xf32> to vector<32x16xf32>
    %141 = arith.mulf %138, %140 : vector<32x16xf32>
    %c0_73 = arith.constant 0 : index
    %c0_74 = arith.constant 0 : index
    %142 = vector.load %arg22[%c0_73, %c0_74] : memref<1x16xf32, #tpu.memory_space<vmem>>, vector<1x16xf32>
    %143 = vector.broadcast %142 : vector<1x16xf32> to vector<32x16xf32>
    %144 = arith.addf %141, %143 : vector<32x16xf32>
    %145 = vector.shape_cast %144 : vector<32x16xf32> to vector<2x16x16xf32>
    %c0_75 = arith.constant 0 : index
    %c0_76 = arith.constant 0 : index
    %146 = vector.load %arg23[%c0_75, %c0_76] : memref<1x16xf32, #tpu.memory_space<vmem>>, vector<1x16xf32>
    %147 = vector.shape_cast %146 : vector<1x16xf32> to vector<1x1x16xf32>
    %148 = vector.broadcast %147 : vector<1x1x16xf32> to vector<2x16x16xf32>
    %149 = arith.mulf %145, %148 : vector<2x16x16xf32>
    %cst_77 = arith.constant dense<0.000000e+00> : vector<2x16xf32>
    %150 = vector.multi_reduction <add>, %149, %cst_77 [2] : vector<2x16x16xf32> to vector<2x16xf32>
    %c0_78 = arith.constant 0 : index
    %c0_79 = arith.constant 0 : index
    %151 = vector.load %arg24[%c0_78, %c0_79] : memref<1x1xf32, #tpu.memory_space<vmem>>, vector<1x1xf32>
    %152 = vector.broadcast %151 : vector<1x1xf32> to vector<2x16xf32>
    %153 = arith.addf %150, %152 : vector<2x16xf32>
    %154 = arith.negf %153 : vector<2x16xf32>
    %155 = math.exp %154 : vector<2x16xf32>
    %cst_80 = arith.constant 1.000000e+00 : f32
    %156 = vector.broadcast %cst_80 : f32 to vector<2x16xf32>
    %157 = arith.addf %156, %155 : vector<2x16xf32>
    %158 = arith.divf %156, %157 : vector<2x16xf32>
    %c0_81 = arith.constant 0 : index
    %c0_82 = arith.constant 0 : index
    %159 = vector.load %arg25[%c0_81, %c0_82] : memref<2x16xf32, #tpu.memory_space<vmem>>, vector<2x16xf32>
    tpu.vector_store %arg25[%c0_81, %c0_82], %158 {strides = array<i32>} : memref<2x16xf32, #tpu.memory_space<vmem>>, vector<2x16xf32>,
    return
  }
  func.func @transform_0(%arg0: i32) -> (i32, i32) {
    %c0_i32 = arith.constant 0 : i32
    %c0_i32_0 = arith.constant 0 : i32
    return %arg0, %c0_i32 : i32, i32
  }
  func.func @transform_1(%arg0: i32) -> (i32, i32) {
    %c0_i32 = arith.constant 0 : i32
    %c0_i32_0 = arith.constant 0 : i32
    return %arg0, %c0_i32 : i32, i32
  }
  func.func @transform_2(%arg0: i32) -> (i32, i32) {
    %c0_i32 = arith.constant 0 : i32
    %c0_i32_0 = arith.constant 0 : i32
    %c0_i32_1 = arith.constant 0 : i32
    return %c0_i32, %c0_i32_0 : i32, i32
  }
  func.func @transform_3(%arg0: i32) -> (i32, i32) {
    %c0_i32 = arith.constant 0 : i32
    %c0_i32_0 = arith.constant 0 : i32
    %c0_i32_1 = arith.constant 0 : i32
    return %c0_i32, %c0_i32_0 : i32, i32
  }
  func.func @transform_4(%arg0: i32) -> (i32, i32) {
    %c0_i32 = arith.constant 0 : i32
    %c0_i32_0 = arith.constant 0 : i32
    %c0_i32_1 = arith.constant 0 : i32
    return %c0_i32, %c0_i32_0 : i32, i32
  }
  func.func @transform_5(%arg0: i32) -> (i32, i32) {
    %c0_i32 = arith.constant 0 : i32
    %c0_i32_0 = arith.constant 0 : i32
    %c0_i32_1 = arith.constant 0 : i32
    return %c0_i32, %c0_i32_0 : i32, i32
  }
  func.func @transform_6(%arg0: i32) -> (i32, i32) {
    %c0_i32 = arith.constant 0 : i32
    %c0_i32_0 = arith.constant 0 : i32
    %c0_i32_1 = arith.constant 0 : i32
    return %c0_i32, %c0_i32_0 : i32, i32
  }
  func.func @transform_7(%arg0: i32) -> (i32, i32) {
    %c0_i32 = arith.constant 0 : i32
    %c0_i32_0 = arith.constant 0 : i32
    %c0_i32_1 = arith.constant 0 : i32
    return %c0_i32, %c0_i32_0 : i32, i32
  }
  func.func @transform_8(%arg0: i32) -> (i32, i32) {
    %c0_i32 = arith.constant 0 : i32
    %c0_i32_0 = arith.constant 0 : i32
    %c0_i32_1 = arith.constant 0 : i32
    return %c0_i32, %c0_i32_0 : i32, i32
  }
  func.func @transform_9(%arg0: i32) -> (i32, i32) {
    %c0_i32 = arith.constant 0 : i32
    %c0_i32_0 = arith.constant 0 : i32
    %c0_i32_1 = arith.constant 0 : i32
    return %c0_i32, %c0_i32_0 : i32, i32
  }
  func.func @transform_10(%arg0: i32) -> (i32, i32) {
    %c0_i32 = arith.constant 0 : i32
    %c0_i32_0 = arith.constant 0 : i32
    %c0_i32_1 = arith.constant 0 : i32
    return %c0_i32, %c0_i32_0 : i32, i32
  }
  func.func @transform_11(%arg0: i32) -> (i32, i32) {
    %c0_i32 = arith.constant 0 : i32
    %c0_i32_0 = arith.constant 0 : i32
    %c0_i32_1 = arith.constant 0 : i32
    return %c0_i32, %c0_i32_0 : i32, i32
  }
  func.func @transform_12(%arg0: i32) -> (i32, i32) {
    %c0_i32 = arith.constant 0 : i32
    %c0_i32_0 = arith.constant 0 : i32
    %c0_i32_1 = arith.constant 0 : i32
    return %c0_i32, %c0_i32_0 : i32, i32
  }
  func.func @transform_13(%arg0: i32) -> (i32, i32) {
    %c0_i32 = arith.constant 0 : i32
    %c0_i32_0 = arith.constant 0 : i32
    %c0_i32_1 = arith.constant 0 : i32
    return %c0_i32, %c0_i32_0 : i32, i32
  }
  func.func @transform_14(%arg0: i32) -> (i32, i32) {
    %c0_i32 = arith.constant 0 : i32
    %c0_i32_0 = arith.constant 0 : i32
    %c0_i32_1 = arith.constant 0 : i32
    return %c0_i32, %c0_i32_0 : i32, i32
  }
  func.func @transform_15(%arg0: i32) -> (i32, i32) {
    %c0_i32 = arith.constant 0 : i32
    %c0_i32_0 = arith.constant 0 : i32
    %c0_i32_1 = arith.constant 0 : i32
    return %c0_i32, %c0_i32_0 : i32, i32
  }
  func.func @transform_16(%arg0: i32) -> (i32, i32) {
    %c0_i32 = arith.constant 0 : i32
    %c0_i32_0 = arith.constant 0 : i32
    %c0_i32_1 = arith.constant 0 : i32
    return %c0_i32, %c0_i32_0 : i32, i32
  }
  func.func @transform_17(%arg0: i32) -> (i32, i32) {
    %c0_i32 = arith.constant 0 : i32
    %c0_i32_0 = arith.constant 0 : i32
    %c0_i32_1 = arith.constant 0 : i32
    return %c0_i32, %c0_i32_0 : i32, i32
  }
  func.func @transform_18(%arg0: i32) -> (i32, i32) {
    %c0_i32 = arith.constant 0 : i32
    %c0_i32_0 = arith.constant 0 : i32
    %c0_i32_1 = arith.constant 0 : i32
    return %c0_i32, %c0_i32_0 : i32, i32
  }
  func.func @transform_19(%arg0: i32) -> (i32, i32) {
    %c0_i32 = arith.constant 0 : i32
    %c0_i32_0 = arith.constant 0 : i32
    %c0_i32_1 = arith.constant 0 : i32
    return %c0_i32, %c0_i32_0 : i32, i32
  }
  func.func @transform_20(%arg0: i32) -> (i32, i32) {
    %c0_i32 = arith.constant 0 : i32
    %c0_i32_0 = arith.constant 0 : i32
    %c0_i32_1 = arith.constant 0 : i32
    return %c0_i32, %c0_i32_0 : i32, i32
  }
  func.func @transform_21(%arg0: i32) -> (i32, i32) {
    %c0_i32 = arith.constant 0 : i32
    %c0_i32_0 = arith.constant 0 : i32
    %c0_i32_1 = arith.constant 0 : i32
    return %c0_i32, %c0_i32_0 : i32, i32
  }
  func.func @transform_22(%arg0: i32) -> (i32, i32) {
    %c0_i32 = arith.constant 0 : i32
    %c0_i32_0 = arith.constant 0 : i32
    %c0_i32_1 = arith.constant 0 : i32
    return %c0_i32, %c0_i32_0 : i32, i32
  }
  func.func @transform_23(%arg0: i32) -> (i32, i32) {
    %c0_i32 = arith.constant 0 : i32
    %c0_i32_0 = arith.constant 0 : i32
    %c0_i32_1 = arith.constant 0 : i32
    return %c0_i32, %c0_i32_0 : i32, i32
  }
  func.func @transform_24(%arg0: i32) -> (i32, i32) {
    %c0_i32 = arith.constant 0 : i32
    %c0_i32_0 = arith.constant 0 : i32
    return %arg0, %c0_i32 : i32, i32
  }
}

</mosaic_0001>

<bundles_post_ra>
// kernel: tpu_custom_call.1
= control target key start
LH: loop header
LB: loop body
LE: loop exit
PB: predicated region body
PF: predicated region fallthrough
CT: control target
= control target key end

     0   :  { %s2146_s0 = inlined_call_operand.vmem [shape: f32[32,80], index: 0, kind: input, shape index: {}]   ;;  %s2147_s1 = inlined_call_operand.vmem [shape: f32[32,64], index: 1, kind: input, shape index: {}]   ;;  %s2148_s2 = inlined_call_operand.vmem [shape: f32[80,16], index: 2, kind: input, shape index: {}]   ;;  %s2149_s3 = inlined_call_operand.vmem [shape: f32[1,16], index: 3, kind: input, shape index: {}]   ;;  %s2150_s4 = inlined_call_operand.vmem [shape: f32[64,16], index: 4, kind: input, shape index: {}]   ;;  %s2151_s5 = inlined_call_operand.vmem [shape: f32[1,16], index: 5, kind: input, shape index: {}]   ;;  %s2152_s6 = inlined_call_operand.vmem [shape: f32[16,16], index: 6, kind: input, shape index: {}]   ;;  %s2153_s7 = inlined_call_operand.vmem [shape: f32[1,16], index: 7, kind: input, shape index: {}]   ;;  %s2154_s8 = inlined_call_operand.vmem [shape: f32[16,32], index: 8, kind: input, shape index: {}]   ;;  %s2155_s9 = inlined_call_operand.vmem [shape: f32[1,32], index: 9, kind: input, shape index: {}]   ;;  %s2156_s10 = inlined_call_operand.vmem [shape: f32[16,16], index: 10, kind: input, shape index: {}]   ;;  %s2157_s11 = inlined_call_operand.vmem [shape: f32[1,16], index: 11, kind: input, shape index: {}]   ;;  %s2158_s12 = inlined_call_operand.vmem [shape: f32[16,16], index: 12, kind: input, shape index: {}]   ;;  %s2159_s13 = inlined_call_operand.vmem [shape: f32[1,16], index: 13, kind: input, shape index: {}]   ;;  %s2160_s14 = inlined_call_operand.vmem [shape: f32[1,16], index: 14, kind: input, shape index: {}]   ;;  %s2161_s15 = inlined_call_operand.vmem [shape: f32[1,16], index: 15, kind: input, shape index: {}]   ;;  %s2162_s16 = inlined_call_operand.vmem [shape: f32[16,16], index: 16, kind: input, shape index: {}]   ;;  %s2163_s17 = inlined_call_operand.vmem [shape: f32[1,16], index: 17, kind: input, shape index: {}]   ;;  %s2164_s18 = inlined_call_operand.vmem [shape: f32[16,16], index: 18, kind: input, shape index: {}]   ;;  %s2165_s19 = inlined_call_operand.vmem [shape: f32[1,16], index: 19, kind: input, shape index: {}]   ;;  %s2166_s20 = inlined_call_operand.vmem [shape: f32[1,16], index: 20, kind: input, shape index: {}]   ;;  %s2167_s21 = inlined_call_operand.vmem [shape: f32[1,16], index: 21, kind: input, shape index: {}]   ;;  %s2168_s22 = inlined_call_operand.vmem [shape: f32[1,16], index: 22, kind: input, shape index: {}]   ;;  %s2169_s23 = inlined_call_operand.<no memory space> [shape: f32[1,1], index: 23, kind: input, shape index: {}]   ;;  %s2170_s24 = inlined_call_operand.hbm [shape: f32[2,16], index: 24, kind: output, shape index: {}]  }
   0x1   :  { %2177 = sst [smem:[#allocation6_spill]] %s2146_s0  ;;  %v29_v0 = vstv %s2169_s23 }
   0x2   :  { %2178 = sst [smem:[#allocation7_spill]] %s2147_s1  ;;  %30 = vst [vmem:[#allocation2] sm:$0x1] %v29_v0 }
   0x3   :  { %2179 = sst [smem:[#allocation8_spill]] %s2148_s2 }
   0x4   :  { %2180 = sst [smem:[#allocation9_spill]] %s2149_s3 }
   0x5   :  { %2181 = sst [smem:[#allocation10_spill]] %s2150_s4 }
   0x6   :  { %2182 = sst [smem:[#allocation11_spill]] %s2151_s5 }
   0x7   :  { %2183 = sst [smem:[#allocation12_spill]] %s2152_s6 }
   0x8   :  { %2184 = sst [smem:[#allocation13_spill]] %s2153_s7 }
   0x9   :  { %2185 = sst [smem:[#allocation14_spill]] %s2154_s8 }
   0xa   :  { %s2186_s6 = sld [smem:[#allocation8_spill]] }
  0x10   :  { %v97_v1 = vld [vmem:[%s2186_s6 + $0x48] sm:$0xff]  ;;  %v96_v2 = vld [vmem:[%s2186_s6 + $0x40] sm:$0xff]  ;;  %v95_v3 = vld [vmem:[%s2186_s6 + $0x38] sm:$0xff] }
  0x11   :  { %121 = vmatpush.msra.mxu0 %v97_v1  ;;  %v94_v4 = vld [vmem:[%s2186_s6 + $0x30] sm:$0xff]  ;;  %v93_v5 = vld [vmem:[%s2186_s6 + $0x28] sm:$0xff]  ;;  %v92_v6 = vld [vmem:[%s2186_s6 + $0x20] sm:$0xff] }
  0x13   :  { %122 = vmatpush.msra.mxu0 %v96_v2 }
  0x15   :  { %123 = vmatpush.msra.mxu0 %v95_v3 }
  0x17   :  { %124 = vmatpush.msra.mxu0 %v94_v4 }
  0x19   :  { %125 = vmatpush.msra.mxu0 %v93_v5 }
  0x1a   :  { %31 = vsyncpa [#allocation4], 0  ;;  %v91_v7 = vld [vmem:[%s2186_s6 + $0x18] sm:$0xff]  ;;  %v90_v8 = vld [vmem:[%s2186_s6 + $0x10] sm:$0xff]  ;;  %s2187_s29 = sld [smem:[#allocation10_spill]]  ;;  %vm102_vm0 = vcmask 654336  }
  0x1b   :  { %126 = vmatpush.msra.mxu0 %v92_v6  ;;  %v89_v11 = vld [vmem:[%s2186_s6 + $0x8] sm:$0xff]  ;;  %v88_v13 = vld [vmem:[%s2186_s6] sm:$0xff]  ;;  %s2188_s28 = sld [smem:[#allocation6_spill]]  ;;  %vm160_vm1 = vcmask 523264   ;;  %vm212_vm2 = vcmask 130048   ;;  %vm355_vm3 = vcmask 64512  }
  0x1c   :  { %s2189_s26 = sld [smem:[#allocation7_spill]]  ;;  %v255_v51 = vld [vmem:[%s2156_s10 + $0x8] sm:$0xff]  ;;  %v254_v52 = vld [vmem:[%s2156_s10] sm:$0xff]  ;;  %s1583_s0 = smov 120  }
  0x1d   :  { %127 = vmatpush.msra.mxu0 %v91_v7  ;;  %s2190_s23 = sld [smem:[#allocation12_spill]]  ;;  %286 = vmatpush.msra.mxu3 %v255_v51  ;;  %v1480_v5 = vld [vmem:[%s2155_s9] ss:$0 sm:$0xff]  ;;  %s1586_s30 = smov 8  }
  0x1e   :  { %s2192_s7 = sld [smem:[#allocation14_spill]] }
  0x1f   :  { %128 = vmatpush.msra.mxu0 %v90_v8  ;;  %s2193_s25 = sld [smem:[#allocation11_spill]]  ;;  %287 = vmatpush.msra.mxu3 %v254_v52 }
  0x20   :  { %v155_v9 = vld [vmem:[%s2187_s29 + $0x38] sm:$0xff]  ;;  %v154_v10 = vld [vmem:[%s2187_s29 + $0x30] sm:$0xff]  ;;  %v153_v12 = vld [vmem:[%s2187_s29 + $0x28] sm:$0xff]  ;;  %s2194_s2 = sld [smem:[#allocation13_spill]] }
  0x21   :  { %181 = vmatpush.msra.mxu1 %v155_v9  ;;  %v152_v14 = vld [vmem:[%s2187_s29 + $0x20] sm:$0xff]  ;;  %129 = vmatpush.msra.mxu0 %v89_v11  ;;  %v151_v16 = vld [vmem:[%s2187_s29 + $0x18] sm:$0xff]  ;;  %v150_v17 = vld [vmem:[%s2187_s29 + $0x10] sm:$0xff] }
  0x22   :  { %v80_v15 = vld [vmem:[%s2188_s28] sm:$0xff]  ;;  %v149_v18 = vld [vmem:[%s2187_s29 + $0x8] sm:$0xff]  ;;  %v82_v22 = vld [vmem:[%s2188_s28 + $0x10] sm:$0xff] }
  0x23   :  { %182 = vmatpush.msra.mxu1 %v154_v10  ;;  %130 = vmatpush.msra.mxu0 %v88_v13  ;;  %v148_v19 = vld [vmem:[%s2187_s29] sm:$0xff]  ;;  %v81_v20 = vld [vmem:[%s2188_s28 + $0x8] sm:$0xff]  ;;  %v83_v24 = vld [vmem:[%s2188_s28 + $0x18] sm:$0xff]  ;;  %s2191_s29 = sld [smem:[#allocation9_spill]] }
  0x24   :  { %1384 = vmatmul.msk.f32.vlgmr.msra.gmra.mxu0 %vm102_vm0, %v80_v15  ;;  %v84_v21 = vld [vmem:[%s2189_s26] sm:$0xff]  ;;  %v85_v23 = vld [vmem:[%s2189_s26 + $0x8] sm:$0xff]  ;;  %v86_v27 = vld [vmem:[%s2189_s26 + $0x10] sm:$0xff] }
  0x25   :  { %183 = vmatpush.msra.mxu1 %v153_v12  ;;  %v207_v25 = vld [vmem:[%s2190_s23 + $0x8] sm:$0xff]  ;;  %v206_v26 = vld [vmem:[%s2190_s23] sm:$0xff]  ;;  %v87_v28 = vld [vmem:[%s2189_s26 + $0x18] sm:$0xff]  ;;  %s1375_s23 = sshll.u32 %s2170_s24, 4  ;;  %s1376_s23 = int_to_ptr.hbm [resolvable:$true] %s1375_s23 }
  0x26   :  { %239 = vmatpush.msrb.mxu0 %v207_v25  ;;  %1444 = vmatpush.msra.mxu2 %v207_v25  ;;  %v302_v30 = vld [vmem:[%s2192_s7 + $0x8] sm:$0xff]  ;;  %v301_v31 = vld [vmem:[%s2192_s7] sm:$0xff]  ;;  %s1585_s7 = smov 104  }
  0x27   :  { %184 = vmatpush.msra.mxu1 %v152_v14  ;;  %v1478_v44 = vld [vmem:[%s2193_s25] ss:$0 sm:$0xff] }
  0x28   :  { %240 = vmatpush.msrb.mxu0 %v206_v26  ;;  %1445 = vmatpush.msra.mxu2 %v206_v26  ;;  %v1479_v59 = vld [vmem:[%s2194_s2] ss:$0 sm:$0xff] }
  0x29   :  { %185 = vmatpush.msra.mxu1 %v151_v16  ;;  %v1477_v29 = vld [vmem:[%s2191_s29] ss:$0 sm:$0xff] }
  0x2a   :  { %333 = vmatpush.msrb.mxu2 %v302_v30  ;;  %v1481_v14 = vld [vmem:[%s2157_s11] ss:$0 sm:$0xff]  ;;  %s1584_s11 = smov 112  }
  0x2b   :  { %186 = vmatpush.msra.mxu1 %v150_v17 }
  0x2c   :  { %1385 = vmatmul.msk.f32.gmra.mxu0 %vm102_vm0, %v81_v20  ;;  %334 = vmatpush.msrb.mxu2 %v301_v31 }
  0x2d   :  { %187 = vmatpush.msra.mxu1 %v149_v18 }
  0x2f   :  { %188 = vmatpush.msra.mxu1 %v148_v19 }
  0x30   :  { %1388 = vmatmul.msk.f32.vlgmr.msra.gmra.mxu1 %vm160_vm1, %v84_v21 }
  0x34   :  { %1386 = vmatmul.msk.f32.gmra.mxu0 %vm102_vm0, %v82_v22 }
  0x38   :  { %1389 = vmatmul.msk.f32.gmra.mxu1 %vm160_vm1, %v85_v23 }
  0x3c   :  { %1387 = vmatmul.msk.f32.gmra.mxu0 %vm102_vm0, %v83_v24 }
  0x40   :  { %1390 = vmatmul.msk.f32.gmra.mxu1 %vm160_vm1, %v86_v27 }
  0x48   :  { %1391 = vmatmul.msk.f32.gmra.mxu1 %vm160_vm1, %v87_v28 }
  0xa1   :  { %v132_v32 = vpop.f32.mrf.mxu0 }
  0xa2   :  { %v133_v33 = vadd.f32 %v1477_v29, %v132_v32 }
  0xa4   :  { %v144_v34 = vmax.f32 %v133_v33, 0.0 }
  0xa6   :  { %1392 = vmatmul.msk.f32.vlgmr.msrb.gmra.mxu0 %vm212_vm2, %v144_v34 }
  0xa9   :  { %v135_v35 = vpop.f32.mrf.mxu0 }
  0xaa   :  { %v136_v36 = vadd.f32 %v1477_v29, %v135_v35 }
  0xac   :  { %v145_v37 = vmax.f32 %v136_v36, 0.0 }
  0xad   :  { %v190_v42 = vpop.f32.mrf.mxu1 }
  0xae   :  { %1393 = vmatmul.msk.f32.vlgmr.msra.gmra.mxu2 %vm212_vm2, %v145_v37  ;;  %v191_v46 = vadd.f32 %v1478_v44, %v190_v42 }
  0xb0   :  { %v202_v47 = vmax.f32 %v191_v46, 0.0 }
  0xb1   :  { %v138_v38 = vpop.f32.mrf.mxu0 }
  0xb2   :  { %v139_v39 = vadd.f32 %v1477_v29, %v138_v38 }
  0xb4   :  { %v146_v40 = vmax.f32 %v139_v39, 0.0 }
  0xb5   :  { %v193_v48 = vpop.f32.mrf.mxu1 }
  0xb6   :  { %1394 = vmatmul.msk.f32.gmra.mxu2 %vm212_vm2, %v146_v40  ;;  %v194_v49 = vadd.f32 %v1478_v44, %v193_v48 }
  0xb8   :  { %v203_v50 = vmax.f32 %v194_v49, 0.0 }
  0xb9   :  { %v141_v41 = vpop.f32.mrf.mxu0 }
  0xba   :  { %v142_v43 = vadd.f32 %v1477_v29, %v141_v41  ;;  %v348_v29 = vlaneseq }
  0xbc   :  { %v147_v45 = vmax.f32 %v142_v43, 0.0  ;;  %v349_v30 = vshrl.u32 %v348_v29, 7  ;;  %v1888_v31 = vand.u32 127, %v348_v29 }
  0xbd   :  { %v196_v53 = vpop.f32.mrf.mxu1 }
  0xbe   :  { %1395 = vmatmul.msk.f32.gmra.mxu2 %vm212_vm2, %v147_v45  ;;  %v197_v54 = vadd.f32 %v1478_v44, %v196_v53  ;;  %vm353_vm4 = vcmp.gt.s32.totalorder %v1888_v31, %v349_v30  ;;  %v350_v38 = vadd.s32 8, %v349_v30 }
  0xc0   :  { %v204_v55 = vmax.f32 %v197_v54, 0.0  ;;  %vm354_vm5 = vcmp.gt.s32.totalorder %v1888_v31, %v350_v38 }
  0xc5   :  { %v199_v56 = vpop.f32.mrf.mxu1 }
  0xc6   :  { %1400 = vmatmul.msk.f32.vlgmr.msrb.gmra.mxu2 %vm212_vm2, %v202_v47  ;;  %v200_v57 = vadd.f32 %v1478_v44, %v199_v56 }
  0xc8   :  { %v205_v58 = vmax.f32 %v200_v57, 0.0 }
  0xce   :  { %1401 = vmatmul.msk.f32.gmra.mxu2 %vm212_vm2, %v203_v50 }
  0xd6   :  { %1402 = vmatmul.msk.f32.gmra.mxu2 %vm212_vm2, %v204_v55 }
  0xde   :  { %1403 = vmatmul.msk.f32.gmra.mxu2 %vm212_vm2, %v205_v58 }
 0x123   :  { %v242_v60 = vpop.f32.mrf.mxu0 }
 0x124   :  { %v1839_v61 = vadd.f32 %v1479_v59, %v242_v60 }
 0x126   :  { %1396 = vmatmul.msk.f32.vlgmr.msra.gmra.mxu3 %vm212_vm2, %v1839_v61 }
 0x131   :  { %v245_v62 = vpop.f32.mrf.mxu2 }
 0x132   :  { %v1843_v63 = vadd.f32 %v1479_v59, %v245_v62 }
 0x134   :  { %1397 = vmatmul.msk.f32.gmra.mxu3 %vm212_vm2, %v1843_v63 }
 0x139   :  { %v248_v0 = vpop.f32.mrf.mxu2 }
 0x13a   :  { %v1847_v1 = vadd.f32 %v1479_v59, %v248_v0 }
 0x13c   :  { %1398 = vmatmul.msk.f32.gmra.mxu3 %vm212_vm2, %v1847_v1 }
 0x141   :  { %v251_v2 = vpop.f32.mrf.mxu2 }
 0x142   :  { %v1851_v3 = vadd.f32 %v1479_v59, %v251_v2 }
 0x144   :  { %1399 = vmatmul.msk.f32.gmra.mxu3 %vm212_vm2, %v1851_v3 }
 0x149   :  { %v336_v4 = vpop.f32.mrf.mxu2 }
 0x14a   :  { %v337_v8 = vadd.f32 %v1480_v5, %v336_v4 }
 0x151   :  { %v339_v6 = vpop.f32.mrf.mxu2 }
 0x152   :  { %v340_v7 = vadd.f32 %v1480_v5, %v339_v6 }
 0x154   :  { %610 = vrot.lane.b32.xlu0 %v340_v7, %s1583_s0  ;;  %1404 = vmatpush.xpose.msk.msrb.mxu3 %vm355_vm3, %v340_v7  ;;  %v1862_v9 = vpack.i.bf16 %v337_v8, %v340_v7 }
 0x158   :  { %1405 = vmatpush.xpose.msk.msrb.mxu3 %vm355_vm3, %v337_v8 }
 0x159   :  { %v342_v10 = vpop.f32.mrf.mxu2 }
 0x15a   :  { %v343_v13 = vadd.f32 %v1480_v5, %v342_v10 }
 0x15c   :  { %608 = vrot.lane.b32.xlu0 %v337_v8, %s1583_s0 }
 0x161   :  { %v345_v11 = vpop.f32.mrf.mxu2 }
 0x162   :  { %v346_v12 = vadd.f32 %v1480_v5, %v345_v11 }
 0x164   :  { %1408 = vmatpush.xpose.msk.msrb.mxu1 %vm355_vm3, %v346_v12  ;;  %649 = vrot.lane.b32.xlu2 %v346_v12, %s1583_s0  ;;  %v1873_v15 = vpack.i.bf16 %v343_v13, %v346_v12 }
 0x165   :  { %1446 = vmatpush.xpose.msk.msra.mxu3 %vm355_vm3, %v346_v12 }
 0x168   :  { %1409 = vmatpush.xpose.msk.msrb.mxu1 %vm355_vm3, %v343_v13 }
 0x169   :  { %1447 = vmatpush.xpose.msk.msra.mxu3 %vm355_vm3, %v343_v13 }
 0x16c   :  { %647 = vrot.lane.b32.xlu2 %v343_v13, %s1583_s0 }
 0x1a9   :  { %v289_v16 = vpop.f32.mrf.mxu3 }
 0x1aa   :  { %v290_v17 = vadd.f32 %v1481_v14, %v289_v16 }
 0x1ac   :  { %604 = vrot.lane.b32.xlu1 %v290_v17, %s1583_s0  ;;  %1406 = vmatmul.msk.f32.vlgmr.msrb.gmra.mxu3 %vm355_vm3, %v290_v17 }
 0x1b7   :  { %v292_v18 = vpop.f32.mrf.mxu3 }
 0x1b8   :  { %v293_v19 = vadd.f32 %v1481_v14, %v292_v18 }
 0x1ba   :  { %606 = vrot.lane.b32.xlu1 %v293_v19, %s1583_s0  ;;  %1407 = vmatmul.msk.f32.gmra.mxu3 %vm355_vm3, %v293_v19 }
 0x1be   :  { %v650_v26 = vpop.permute.xlu2 %649 }
 0x1bf   :  { %v295_v20 = vpop.f32.mrf.mxu3  ;;  %1420 = vmatpush.xpose.msk.msra.mxu0 %vm355_vm3, %v650_v26 }
 0x1c0   :  { %v296_v21 = vadd.f32 %v1481_v14, %v295_v20 }
 0x1c2   :  { %643 = vrot.lane.b32.xlu0 %v296_v21, %s1583_s0  ;;  %1410 = vmatmul.msk.f32.vlgmr.msrb.gmra.mxu1 %vm355_vm3, %v296_v21 }
 0x1c6   :  { %v611_v22 = vpop.permute.xlu0 %610  ;;  %v648_v27 = vpop.permute.xlu2 %647 }
 0x1c7   :  { %v298_v23 = vpop.f32.mrf.mxu3  ;;  %1416 = vmatpush.xpose.msk.msra.mxu1 %vm355_vm3, %v611_v22  ;;  %1421 = vmatpush.xpose.msk.msra.mxu0 %vm355_vm3, %v648_v27 }
 0x1c8   :  { %v299_v24 = vadd.f32 %v1481_v14, %v298_v23 }
 0x1ca   :  { %645 = vrot.lane.b32.xlu1 %v299_v24, %s1583_s0  ;;  %1411 = vmatmul.msk.f32.vlgmr.msra.gmra.mxu3 %vm355_vm3, %v299_v24 }
 0x1ce   :  { %v609_v25 = vpop.permute.xlu0 %608 }
 0x1cf   :  { %1417 = vmatpush.xpose.msk.msra.mxu1 %vm355_vm3, %v609_v25 }
 0x21e   :  { %v605_v28 = vpop.permute.xlu1 %604 }
 0x21f   :  { %1418 = vmatmul.msk.f32.vlgmr.msra.gmra.mxu1 %vm355_vm3, %v605_v28 }
 0x22c   :  { %v607_v32 = vpop.permute.xlu1 %606 }
 0x22d   :  { %1419 = vmatmul.msk.f32.gmra.mxu1 %vm355_vm3, %v607_v32 }
 0x22f   :  { %v385_v33 = vpop.f32.mrf.mxu3 }
 0x230   :  { %v426_v34 = vmul.f32 0.35355338, %v385_v33 }
 0x232   :  { %v434_v35 = vsel %vm353_vm4, -1e+30, %v426_v34 }
 0x233   :  { %v438_v36 = vsel %vm212_vm2, %v434_v35, -inf }
 0x234   :  { %v644_v37 = vpop.permute.xlu0 %643  ;;  %439 = vmax.xlane.f32.xlu2 %v438_v36 }
 0x235   :  { %1422 = vmatmul.msk.f32.vlgmr.msra.gmra.mxu0 %vm355_vm3, %v644_v37 }
 0x23c   :  { %v646_v39 = vpop.permute.xlu1 %645 }
 0x23d   :  { %v388_v40 = vpop.f32.mrf.mxu3  ;;  %1423 = vmatmul.msk.f32.gmra.mxu0 %vm355_vm3, %v646_v39 }
 0x23e   :  { %v427_v41 = vmul.f32 0.35355338, %v388_v40 }
 0x23f   :  { %v420_v42 = vpop.f32.mrf.mxu1 }
 0x240   :  { %v428_v43 = vmul.f32 0.35355338, %v420_v42  ;;  %v435_v44 = vsel %vm354_vm5, -1e+30, %v427_v41 }
 0x241   :  { %v441_v45 = vsel %vm212_vm2, %v435_v44, -inf }
 0x242   :  { %442 = vmax.xlane.f32.xlu0 %v441_v45  ;;  %v436_v46 = vsel %vm353_vm4, -1e+30, %v428_v43 }
 0x243   :  { %v444_v47 = vsel %vm212_vm2, %v436_v46, -inf }
 0x244   :  { %445 = vmax.xlane.f32.xlu1 %v444_v47 }
 0x24d   :  { %v423_v48 = vpop.f32.mrf.mxu3 }
 0x24e   :  { %v429_v49 = vmul.f32 0.35355338, %v423_v48 }
 0x250   :  { %v437_v50 = vsel %vm354_vm5, -1e+30, %v429_v49 }
 0x251   :  { %v447_v51 = vsel %vm212_vm2, %v437_v50, -inf }
 0x252   :  { %448 = vmax.xlane.f32.xlu2 %v447_v51 }
 0x29c   :  { %v637_v52 = vpop.f32.mrf.mxu1 }
 0x29d   :  { %v682_v53 = vmul.f32 0.35355338, %v637_v52 }
 0x29f   :  { %v686_v54 = vsel %vm353_vm4, -1e+30, %v682_v53 }
 0x2a0   :  { %v690_v55 = vsel %vm212_vm2, %v686_v54, -inf }
 0x2a1   :  { %691 = vmax.xlane.f32.xlu2 %v690_v55 }
 0x2a7   :  { %v440_v56 = vpop.xlane.xlu2 %439 }
 0x2a8   :  { %v450_v57 = vsub.f32 %v434_v35, %v440_v56 }
 0x2aa   :  { %v454_v58 = vmul.f32 1.442695, %v450_v57  ;;  %v640_v59 = vpop.f32.mrf.mxu1 }
 0x2ab   :  { %v683_v60 = vmul.f32 0.35355338, %v640_v59 }
 0x2ac   :  { %1491 = vpow2.f32 %v454_v58 }
 0x2ad   :  { %v687_v62 = vsel %vm354_vm5, -1e+30, %v683_v60 }
 0x2ae   :  { %v693_v0 = vsel %vm212_vm2, %v687_v62, -inf }
 0x2af   :  { %694 = vmax.xlane.f32.xlu0 %v693_v0 }
 0x2b2   :  { %v676_v2 = vpop.f32.mrf.mxu0  ;;  %v1913_v4 = vpop.eup %1491 }
 0x2b3   :  { %v684_v5 = vmul.f32 0.35355338, %v676_v2  ;;  %v462_v11 = vsel %vm212_vm2, %v1913_v4, 0.0 }
 0x2b5   :  { %v443_v6 = vpop.xlane.xlu0 %442  ;;  %v688_v7 = vsel %vm353_vm4, -1e+30, %v684_v5 }
 0x2b6   :  { %v451_v8 = vsub.f32 %v435_v44, %v443_v6  ;;  %v696_v10 = vsel %vm212_vm2, %v688_v7, -inf }
 0x2b7   :  { %697 = vmax.xlane.f32.xlu1 %v696_v10  ;;  %v446_v12 = vpop.xlane.xlu1 %445  ;;  %463 = vadd.xlane.f32.xlu0 %v462_v11 }
 0x2b8   :  { %v456_v13 = vmul.f32 1.442695, %v451_v8  ;;  %v452_v14 = vsub.f32 %v436_v46, %v446_v12 }
 0x2ba   :  { %1493 = vpow2.f32 %v456_v13  ;;  %v458_v16 = vmul.f32 1.442695, %v452_v14  ;;  %v679_v17 = vpop.f32.mrf.mxu0 }
 0x2bb   :  { %v685_v18 = vmul.f32 0.35355338, %v679_v17 }
 0x2bc   :  { %1495 = vpow2.f32 %v458_v16 }
 0x2bd   :  { %v689_v19 = vsel %vm354_vm5, -1e+30, %v685_v18 }
 0x2be   :  { %v699_v20 = vsel %vm212_vm2, %v689_v19, -inf }
 0x2bf   :  { %700 = vmax.xlane.f32.xlu2 %v699_v20 }
 0x2c0   :  { %v1923_v21 = vpop.eup %1493 }
 0x2c1   :  { %v465_v22 = vsel %vm212_vm2, %v1923_v21, 0.0 }
 0x2c2   :  { %466 = vadd.xlane.f32.xlu1 %v465_v22  ;;  %v1927_v23 = vpop.eup %1495 }
 0x2c3   :  { %v468_v26 = vsel %vm212_vm2, %v1927_v23, 0.0 }
 0x2c5   :  { %v449_v24 = vpop.xlane.xlu2 %448 }
 0x2c6   :  { %v453_v25 = vsub.f32 %v437_v50, %v449_v24 }
 0x2c7   :  { %469 = vadd.xlane.f32.xlu2 %v468_v26 }
 0x2c8   :  { %v460_v27 = vmul.f32 1.442695, %v453_v25 }
 0x2ca   :  { %1497 = vpow2.f32 %v460_v27 }
 0x2cb   :  { %1461 = vrot.lane.b32.xlu0 %v1873_v15, %s1584_s11 }
 0x2d0   :  { %v1932_v28 = vpop.eup %1497 }
 0x2d1   :  { %v471_v29 = vsel %vm212_vm2, %v1932_v28, 0.0 }
 0x2d2   :  { %472 = vadd.xlane.f32.xlu2 %v471_v29 }
 0x2db   :  { %1456 = vrot.lane.b32.xlu1 %v1862_v9, %s1584_s11 }
 0x314   :  { %v692_v30 = vpop.xlane.xlu2 %691 }
 0x315   :  { %v702_v32 = vsub.f32 %v686_v54, %v692_v30 }
 0x317   :  { %v706_v33 = vmul.f32 1.442695, %v702_v32 }
 0x319   :  { %1499 = vpow2.f32 %v706_v33 }
 0x31f   :  { %v1937_v34 = vpop.eup %1499 }
 0x320   :  { %v714_v35 = vsel %vm212_vm2, %v1937_v34, 0.0 }
 0x321   :  { %715 = vadd.xlane.f32.xlu0 %v714_v35 }
 0x322   :  { %v695_v36 = vpop.xlane.xlu0 %694 }
 0x323   :  { %v703_v37 = vsub.f32 %v687_v62, %v695_v36 }
 0x325   :  { %v708_v38 = vmul.f32 1.442695, %v703_v37 }
 0x327   :  { %1501 = vpow2.f32 %v708_v38 }
 0x32a   :  { %v698_v39 = vpop.xlane.xlu1 %697  ;;  %v464_v44 = vpop.xlane.xlu0 %463 }
 0x32b   :  { %v704_v40 = vsub.f32 %v688_v7, %v698_v39  ;;  %v485_v5 = vand.u32 2147483648, %v464_v44  ;;  %vm479_vm7 = vweird.f32 %v464_v44  ;;  %v483_v6 = vand.u32 2147483647, %v464_v44 }
 0x32d   :  { %v1941_v41 = vpop.eup %1501  ;;  %v710_v42 = vmul.f32 1.442695, %v704_v40  ;;  %v486_v11 = vor.u32 1.1754944e-38, %v485_v5  ;;  %vm484_vm9 = vcmp.eq.f32.partialorder %v483_v6, 8.507059e+37 }
 0x32e   :  { %v717_v43 = vsel %vm212_vm2, %v1941_v41, 0.0 }
 0x32f   :  { %1503 = vpow2.f32 %v710_v42  ;;  %718 = vadd.xlane.f32.xlu0 %v717_v43 }
 0x330   :  { %1505 = vrcp.f32 %v464_v44 }
 0x332   :  { %v701_v45 = vpop.xlane.xlu2 %700 }
 0x333   :  { %v705_v46 = vsub.f32 %v689_v19, %v701_v45 }
 0x335   :  { %v1945_v47 = vpop.eup %1503  ;;  %v712_v48 = vmul.f32 1.442695, %v705_v46  ;;  %v467_v49 = vpop.xlane.xlu1 %466 }
 0x336   :  { %v720_v50 = vsel %vm212_vm2, %v1945_v47, 0.0  ;;  %v1506_v51 = vpop.eup %1505  ;;  %v500_v19 = vand.u32 2147483648, %v467_v49  ;;  %vm494_vm11 = vweird.f32 %v467_v49  ;;  %v498_v24 = vand.u32 2147483647, %v467_v49 }
 0x337   :  { %1507 = vpow2.f32 %v712_v48  ;;  %721 = vadd.xlane.f32.xlu2 %v720_v50  ;;  %v475_v52 = vmul.f32 %v1506_v51, %v464_v44  ;;  %vm480_vm6 = vweird.f32 %v1506_v51 }
 0x338   :  { %1509 = vrcp.f32 %v467_v49  ;;  %vm481_vm8 = vmor %vm479_vm7, %vm480_vm6  ;;  %v501_v30 = vor.u32 1.1754944e-38, %v500_v19  ;;  %vm499_vm13 = vcmp.eq.f32.partialorder %v498_v24, 8.507059e+37 }
 0x339   :  { %v476_v55 = vsub.f32 1.0, %v475_v52 }
 0x33a   :  { %v1953_v56 = vpop.xlane.xlu2 %469 }
 0x33b   :  { %1511 = vrcp.f32 %v1953_v56  ;;  %v477_v58 = vmul.f32 %v1506_v51, %v476_v55  ;;  %vm509_vm15 = vweird.f32 %v1953_v56  ;;  %v513_v36 = vand.u32 2147483647, %v1953_v56 }
 0x33d   :  { %v1949_v53 = vpop.eup %1507  ;;  %v478_v60 = vadd.f32 %v1506_v51, %v477_v58  ;;  %v1462_v16 = vpop.permute.xlu0 %1461  ;;  %vm514_vm1 = vcmp.eq.f32.partialorder %v513_v36, 8.507059e+37 }
 0x33e   :  { %v723_v54 = vsel %vm212_vm2, %v1949_v53, 0.0  ;;  %v1510_v57 = vpop.eup %1509  ;;  %v1463_v25 = vunpack.i.l.bf16 %v1462_v16  ;;  %v1464_v32 = vunpack.i.h.bf16 %v1462_v16 }
 0x33f   :  { %724 = vadd.xlane.f32.xlu1 %v723_v54  ;;  %v490_v59 = vmul.f32 %v1510_v57, %v467_v49  ;;  %v482_v7 = vsel %vm481_vm8, %v1506_v51, %v478_v60  ;;  %vm495_vm10 = vweird.f32 %v1510_v57 }
 0x340   :  { %vm496_vm12 = vmor %vm494_vm11, %vm495_vm10 }
 0x341   :  { %v491_v62 = vsub.f32 1.0, %v490_v59  ;;  %v1512_v2 = vpop.eup %1511 }
 0x342   :  { %v505_v10 = vmul.f32 %v1512_v2, %v1953_v56  ;;  %vm510_vm14 = vweird.f32 %v1512_v2 }
 0x343   :  { %1471 = vrot.lane.b32.xlu0 %v1873_v15, %s1585_s7  ;;  %v492_v8 = vmul.f32 %v1510_v57, %v491_v62  ;;  %v487_v15 = vsel %vm484_vm9, %v486_v11, %v482_v7  ;;  %vm511_vm0 = vmor %vm509_vm15, %vm510_vm14 }
 0x344   :  { %v506_v14 = vsub.f32 1.0, %v505_v10  ;;  %v488_v22 = vmul.f32 %v1913_v4, %v487_v15  ;;  %v515_v4 = vand.u32 2147483648, %v1953_v56 }
 0x345   :  { %v1957_v0 = vpop.xlane.xlu2 %472  ;;  %v493_v17 = vadd.f32 %v1510_v57, %v492_v8 }
 0x346   :  { %1513 = vrcp.f32 %v1957_v0  ;;  %v507_v26 = vmul.f32 %v1512_v2, %v506_v14  ;;  %v516_v40 = vor.u32 1.1754944e-38, %v515_v4  ;;  %v530_v44 = vand.u32 2147483648, %v1957_v0 }
 0x347   :  { %v497_v29 = vsel %vm496_vm12, %v1510_v57, %v493_v17  ;;  %vm524_vm5 = vweird.f32 %v1957_v0  ;;  %v528_v46 = vand.u32 2147483647, %v1957_v0 }
 0x348   :  { %v508_v33 = vadd.f32 %v1512_v2, %v507_v26  ;;  %v531_v48 = vor.u32 1.1754944e-38, %v530_v44 }
 0x349   :  { %vm529_vm7 = vcmp.eq.f32.partialorder %v528_v46, 8.507059e+37 }
 0x34a   :  { %v512_v38 = vsel %vm511_vm0, %v1512_v2, %v508_v33 }
 0x34b   :  { %v517_v42 = vsel %vm514_vm1, %v516_v40, %v512_v38 }
 0x34c   :  { %v1514_v18 = vpop.eup %1513  ;;  %v518_v45 = vmul.f32 %v1927_v23, %v517_v42 }
 0x34d   :  { %v1457_v12 = vpop.permute.xlu1 %1456  ;;  %v520_v27 = vmul.f32 %v1514_v18, %v1957_v0  ;;  %vm525_vm4 = vweird.f32 %v1514_v18 }
 0x34e   :  { %v1458_v13 = vunpack.i.l.bf16 %v1457_v12  ;;  %v1459_v20 = vunpack.i.h.bf16 %v1457_v12  ;;  %vm526_vm6 = vmor %vm524_vm5, %vm525_vm4 }
 0x34f   :  { %1466 = vrot.lane.b32.xlu2 %v1862_v9, %s1585_s7  ;;  %v502_v9 = vsel %vm499_vm13, %v501_v30, %v497_v29  ;;  %v521_v35 = vsub.f32 1.0, %v520_v27 }
 0x350   :  { %560 = vmatpush.msrb.mxu3 %v1458_v13  ;;  %v503_v37 = vmul.f32 %v1923_v21, %v502_v9 }
 0x351   :  { %v522_v39 = vmul.f32 %v1514_v18, %v521_v35 }
 0x352   :  { %561 = vmatpush.msrb.mxu3 %v1459_v20 }
 0x353   :  { %1412 = vmatmul.msk.f32.vlgmr.msrb.gmra.mxu3 %vm212_vm2, %v488_v22  ;;  %v523_v43 = vadd.f32 %v1514_v18, %v522_v39 }
 0x354   :  { %595 = vmatpush.msra.mxu3 %v1463_v25 }
 0x355   :  { %v527_v21 = vsel %vm526_vm6, %v1514_v18, %v523_v43 }
 0x356   :  { %596 = vmatpush.msra.mxu3 %v1464_v32  ;;  %v532_v49 = vsel %vm529_vm7, %v531_v48, %v527_v21 }
 0x357   :  { %v533_v50 = vmul.f32 %v1932_v28, %v532_v49 }
 0x35b   :  { %1413 = vmatmul.msk.f32.gmra.mxu3 %vm212_vm2, %v503_v37 }
 0x363   :  { %1414 = vmatmul.msk.f32.vlgmr.msra.gmra.mxu3 %vm212_vm2, %v518_v45 }
 0x36b   :  { %1415 = vmatmul.msk.f32.gmra.mxu3 %vm212_vm2, %v533_v50 }
 0x394   :  { %v716_v51 = vpop.xlane.xlu0 %715 }
 0x395   :  { %1515 = vrcp.f32 %v716_v51  ;;  %v737_v0 = vand.u32 2147483648, %v716_v51  ;;  %vm731_vm9 = vweird.f32 %v716_v51  ;;  %v735_v28 = vand.u32 2147483647, %v716_v51 }
 0x397   :  { %v738_v7 = vor.u32 1.1754944e-38, %v737_v0  ;;  %vm736_vm11 = vcmp.eq.f32.partialorder %v735_v28, 8.507059e+37 }
 0x39b   :  { %v1516_v52 = vpop.eup %1515 }
 0x39c   :  { %v727_v54 = vmul.f32 %v1516_v52, %v716_v51  ;;  %vm732_vm8 = vweird.f32 %v1516_v52 }
 0x39d   :  { %vm733_vm10 = vmor %vm731_vm9, %vm732_vm8 }
 0x39e   :  { %v728_v23 = vsub.f32 1.0, %v727_v54 }
 0x3a0   :  { %v729_v57 = vmul.f32 %v1516_v52, %v728_v23 }
 0x3a2   :  { %v719_v55 = vpop.xlane.xlu0 %718  ;;  %v730_v60 = vadd.f32 %v1516_v52, %v729_v57 }
 0x3a3   :  { %1517 = vrcp.f32 %v719_v55  ;;  %vm746_vm12 = vweird.f32 %v719_v55  ;;  %v752_v13 = vand.u32 2147483648, %v719_v55  ;;  %v750_v22 = vand.u32 2147483647, %v719_v55 }
 0x3a4   :  { %v734_v2 = vsel %vm733_vm10, %v1516_v52, %v730_v60 }
 0x3a5   :  { %v739_v12 = vsel %vm736_vm11, %v738_v7, %v734_v2  ;;  %v753_v33 = vor.u32 1.1754944e-38, %v752_v13  ;;  %vm751_vm5 = vcmp.eq.f32.partialorder %v750_v22, 8.507059e+37 }
 0x3a6   :  { %v740_v26 = vmul.f32 %v1937_v34, %v739_v12 }
 0x3a9   :  { %v1518_v56 = vpop.eup %1517 }
 0x3aa   :  { %v742_v58 = vmul.f32 %v1518_v56, %v719_v55  ;;  %v722_v59 = vpop.xlane.xlu2 %721  ;;  %vm747_vm13 = vweird.f32 %v1518_v56 }
 0x3ab   :  { %1519 = vrcp.f32 %v722_v59  ;;  %v767_v18 = vand.u32 2147483648, %v722_v59  ;;  %v765_v25 = vand.u32 2147483647, %v722_v59  ;;  %vm1979_vm15 = vmor %vm746_vm12, %vm747_vm13  ;;  %vm761_vm0 = vweird.f32 %v722_v59 }
 0x3ac   :  { %v743_v62 = vsub.f32 1.0, %v742_v58 }
 0x3ad   :  { %v768_v35 = vor.u32 1.1754944e-38, %v767_v18  ;;  %vm766_vm4 = vcmp.eq.f32.partialorder %v765_v25, 8.507059e+37 }
 0x3ae   :  { %v744_v5 = vmul.f32 %v1518_v56, %v743_v62 }
 0x3b0   :  { %v745_v17 = vadd.f32 %v1518_v56, %v744_v5  ;;  %v1482_v5 = vld [vmem:[%s2159_s13] ss:$0 sm:$0xff] }
 0x3b1   :  { %v1520_v6 = vpop.eup %1519 }
 0x3b2   :  { %v725_v8 = vpop.xlane.xlu1 %724  ;;  %v757_v10 = vmul.f32 %v1520_v6, %v722_v59  ;;  %v1467_v11 = vpop.permute.xlu2 %1466  ;;  %vm762_vm14 = vweird.f32 %v1520_v6  ;;  %v749_v9 = vsel %vm1979_vm15, %v1518_v56, %v745_v17  ;;  %v877_v56 = vld [vmem:[%s2158_s12 + $0x8] sm:$0xff] }
 0x3b3   :  { %1521 = vrcp.f32 %v725_v8  ;;  %v1468_v15 = vunpack.i.l.bf16 %v1467_v11  ;;  %v1469_v19 = vunpack.i.h.bf16 %v1467_v11  ;;  %vm763_vm1 = vmor %vm761_vm0, %vm762_vm14  ;;  %v754_v38 = vsel %vm751_vm5, %v753_v33, %v749_v9  ;;  %908 = vmatpush.msrb.mxu1 %v877_v56 }
 0x3b4   :  { %v758_v14 = vsub.f32 1.0, %v757_v10  ;;  %v782_v39 = vand.u32 2147483648, %v725_v8  ;;  %v780_v43 = vand.u32 2147483647, %v725_v8  ;;  %v755_v44 = vmul.f32 %v1941_v41, %v754_v38 }
 0x3b5   :  { %v1472_v16 = vpop.permute.xlu0 %1471  ;;  %812 = vmatpush.msra.mxu2 %v1468_v15  ;;  %vm776_vm7 = vweird.f32 %v725_v8 }
 0x3b6   :  { %v1473_v20 = vunpack.i.l.bf16 %v1472_v16  ;;  %v759_v24 = vmul.f32 %v1520_v6, %v758_v14  ;;  %v1474_v27 = vunpack.i.h.bf16 %v1472_v16  ;;  %v783_v46 = vor.u32 1.1754944e-38, %v782_v39 }
 0x3b7   :  { %813 = vmatpush.msra.mxu2 %v1469_v19  ;;  %vm781_vm9 = vcmp.eq.f32.partialorder %v780_v43, 8.507059e+37 }
 0x3b8   :  { %847 = vmatpush.msrb.mxu3 %v1473_v20  ;;  %v760_v32 = vadd.f32 %v1520_v6, %v759_v24  ;;  %1424 = vmatmul.msk.f32.vlgmr.msra.gmra.mxu2 %vm212_vm2, %v740_v26  ;;  %v1587_v24 = vmov 16.0  }
 0x3b9   :  { %v1522_v30 = vpop.eup %1521  ;;  %1523 = vrcp.f32 %v1587_v24 }
 0x3ba   :  { %v772_v34 = vmul.f32 %v1522_v30, %v725_v8  ;;  %848 = vmatpush.msrb.mxu3 %v1474_v27  ;;  %v764_v4 = vsel %vm763_vm1, %v1520_v6, %v760_v32  ;;  %vm777_vm6 = vweird.f32 %v1522_v30 }
 0x3bb   :  { %v769_v36 = vsel %vm766_vm4, %v768_v35, %v764_v4  ;;  %vm778_vm8 = vmor %vm776_vm7, %vm777_vm6 }
 0x3bc   :  { %v773_v37 = vsub.f32 1.0, %v772_v34  ;;  %v770_v40 = vmul.f32 %v1945_v47, %v769_v36 }
 0x3be   :  { %v774_v42 = vmul.f32 %v1522_v30, %v773_v37  ;;  %1426 = vmatmul.msk.f32.vlgmr.msrb.gmra.mxu3 %vm212_vm2, %v770_v40 }
 0x3c0   :  { %v775_v45 = vadd.f32 %v1522_v30, %v774_v42  ;;  %1425 = vmatmul.msk.f32.gmra.mxu2 %vm212_vm2, %v755_v44 }
 0x3c2   :  { %v779_v21 = vsel %vm778_vm8, %v1522_v30, %v775_v45 }
 0x3c3   :  { %v784_v48 = vsel %vm781_vm9, %v783_v46, %v779_v21 }
 0x3c4   :  { %v785_v49 = vmul.f32 %v1949_v53, %v784_v48  ;;  %v876_v53 = vld [vmem:[%s2158_s12] sm:$0xff] }
 0x3c5   :  { %909 = vmatpush.msrb.mxu1 %v876_v53 }
 0x3c6   :  { %1427 = vmatmul.msk.f32.gmra.mxu3 %vm212_vm2, %v785_v49  ;;  %v1039_v49 = vld [vmem:[%s2162_s16 + $0x8] sm:$0xff] }
 0x3c7   :  { %1070 = vmatpush.msrb.mxu0 %v1039_v49 }
 0x3d6   :  { %v563_v47 = vpop.f32.mrf.mxu3 }
 0x3de   :  { %v566_v50 = vpop.f32.mrf.mxu3 }
 0x3e6   :  { %v598_v51 = vpop.f32.mrf.mxu3 }
 0x3ee   :  { %v601_v52 = vpop.f32.mrf.mxu3 }
 0x43b   :  { %v815_v54 = vpop.f32.mrf.mxu2 }
 0x43c   :  { %860 = vrot.lane.b32.xlu0 %v815_v54, %s1586_s30 }
 0x441   :  { %v850_v41 = vpop.f32.mrf.mxu3 }
 0x443   :  { %v818_v55 = vpop.f32.mrf.mxu2 }
 0x444   :  { %864 = vrot.lane.b32.xlu0 %v850_v41, %s1586_s30  ;;  %862 = vrot.lane.b32.xlu2 %v818_v55, %s1586_s30 }
 0x449   :  { %v853_v23 = vpop.f32.mrf.mxu3 }
 0x44c   :  { %866 = vrot.lane.b32.xlu2 %v853_v23, %s1586_s30 }
 0x49e   :  { %v863_v59 = vpop.permute.xlu2 %862 }
 0x49f   :  { %v873_v60 = vsel %vm355_vm3, %v566_v50, %v863_v59 }
 0x4a6   :  { %v867_v28 = vpop.permute.xlu2 %866 }
 0x4a7   :  { %v875_v2 = vsel %vm355_vm3, %v601_v52, %v867_v28 }
 0x4ae   :  { %v861_v57 = vpop.permute.xlu0 %860 }
 0x4af   :  { %v872_v58 = vsel %vm355_vm3, %v563_v47, %v861_v57  ;;  %v1038_v47 = vld [vmem:[%s2162_s16] sm:$0xff] }
 0x4b0   :  { %1428 = vmatmul.msk.f32.vlgmr.msrb.gmra.mxu1 %vm212_vm2, %v872_v58  ;;  %1071 = vmatpush.msrb.mxu0 %v1038_v47 }
 0x4b6   :  { %v865_v62 = vpop.permute.xlu0 %864 }
 0x4b7   :  { %v874_v0 = vsel %vm355_vm3, %v598_v51, %v865_v62 }
 0x4b8   :  { %1429 = vmatmul.msk.f32.gmra.mxu1 %vm212_vm2, %v873_v60 }
 0x4c0   :  { %1430 = vmatmul.msk.f32.gmra.mxu1 %vm212_vm2, %v874_v0 }
 0x4c8   :  { %1431 = vmatmul.msk.f32.gmra.mxu1 %vm212_vm2, %v875_v2 }
 0x52d   :  { %v911_v6 = vpop.f32.mrf.mxu1 }
 0x52e   :  { %v912_v7 = vadd.f32 %v1482_v5, %v911_v6 }
 0x530   :  { %v923_v8 = vadd.f32 %v912_v7, %v1839_v61 }
 0x532   :  { %v927_v10 = vsel %vm212_vm2, %v923_v8, 0.0 }
 0x533   :  { %928 = vadd.xlane.f32.xlu0 %v927_v10  ;;  %v1484_v10 = vld [vmem:[%s2161_s15] ss:$0 sm:$0xff] }
 0x535   :  { %v914_v11 = vpop.f32.mrf.mxu1 }
 0x536   :  { %v915_v12 = vadd.f32 %v1482_v5, %v914_v11 }
 0x538   :  { %v924_v15 = vadd.f32 %v915_v12, %v1843_v63  ;;  %v1524_v63 = vpop.eup %1523 }
 0x539   :  { %v940_v25 = vmul.f32 16.0, %v1524_v63  ;;  %vm944_vm3 = vweird.f32 %v1524_v63 }
 0x53a   :  { %v930_v13 = vsel %vm212_vm2, %v924_v15, 0.0 }
 0x53b   :  { %931 = vadd.xlane.f32.xlu2 %v930_v13  ;;  %v941_v26 = vsub.f32 1.0, %v940_v25 }
 0x53d   :  { %v917_v14 = vpop.f32.mrf.mxu1  ;;  %v942_v27 = vmul.f32 %v1524_v63, %v941_v26 }
 0x53e   :  { %v918_v16 = vadd.f32 %v1482_v5, %v917_v14 }
 0x53f   :  { %v943_v29 = vadd.f32 %v1524_v63, %v942_v27 }
 0x540   :  { %v925_v17 = vadd.f32 %v918_v16, %v1847_v1 }
 0x541   :  { %v2017_v30 = vsel %vm944_vm3, %v1524_v63, %v943_v29 }
 0x542   :  { %v933_v18 = vsel %vm212_vm2, %v925_v17, 0.0 }
 0x543   :  { %934 = vadd.xlane.f32.xlu1 %v933_v18 }
 0x545   :  { %v920_v19 = vpop.f32.mrf.mxu1 }
 0x546   :  { %v921_v20 = vadd.f32 %v1482_v5, %v920_v19  ;;  %v1483_v5 = vld [vmem:[%s2160_s14] ss:$0 sm:$0xff] }
 0x548   :  { %v926_v61 = vadd.f32 %v921_v20, %v1851_v3 }
 0x54a   :  { %v936_v22 = vsel %vm212_vm2, %v926_v61, 0.0 }
 0x54b   :  { %937 = vadd.xlane.f32.xlu1 %v936_v22 }
 0x5a6   :  { %v929_v1 = vpop.xlane.xlu0 %928 }
 0x5a7   :  { %v946_v32 = vmul.f32 %v2017_v30, %v929_v1 }
 0x5a9   :  { %v950_v9 = vsub.f32 %v923_v8, %v946_v32 }
 0x5ab   :  { %v954_v33 = vmul.f32 %v950_v9, %v950_v9 }
 0x5ad   :  { %v958_v3 = vsel %vm212_vm2, %v954_v33, 0.0 }
 0x5ae   :  { %959 = vadd.xlane.f32.xlu1 %v958_v3  ;;  %v932_v35 = vpop.xlane.xlu2 %931 }
 0x5af   :  { %v947_v34 = vmul.f32 %v2017_v30, %v932_v35 }
 0x5b1   :  { %v2022_v4 = vsub.f32 %v924_v15, %v947_v34 }
 0x5b3   :  { %v955_v36 = vmul.f32 %v2022_v4, %v2022_v4 }
 0x5b5   :  { %v961_v37 = vsel %vm212_vm2, %v955_v36, 0.0 }
 0x5b6   :  { %v935_v38 = vpop.xlane.xlu1 %934  ;;  %962 = vadd.xlane.f32.xlu1 %v961_v37 }
 0x5b7   :  { %v948_v39 = vmul.f32 %v2017_v30, %v935_v38 }
 0x5b9   :  { %v2028_v40 = vsub.f32 %v925_v17, %v948_v39 }
 0x5bb   :  { %v956_v42 = vmul.f32 %v2028_v40, %v2028_v40 }
 0x5bd   :  { %v964_v43 = vsel %vm212_vm2, %v956_v42, 0.0 }
 0x5be   :  { %v938_v44 = vpop.xlane.xlu1 %937  ;;  %965 = vadd.xlane.f32.xlu1 %v964_v43 }
 0x5bf   :  { %v949_v45 = vmul.f32 %v2017_v30, %v938_v44  ;;  %v1089_v44 = vld [vmem:[%s2164_s18] sm:$0xff] }
 0x5c1   :  { %v2034_v46 = vsub.f32 %v926_v61, %v949_v45  ;;  %v1485_v45 = vld [vmem:[%s2163_s17] ss:$0 sm:$0xff] }
 0x5c3   :  { %v957_v21 = vmul.f32 %v2034_v46, %v2034_v46 }
 0x5c5   :  { %v967_v48 = vsel %vm212_vm2, %v957_v21, 0.0 }
 0x5c6   :  { %968 = vadd.xlane.f32.xlu0 %v967_v48 }
 0x621   :  { %v960_v50 = vpop.xlane.xlu1 %959 }
 0x622   :  { %v970_v51 = vmul.f32 %v960_v50, %v2017_v30 }
 0x624   :  { %v974_v52 = vadd.f32 1e-05, %v970_v51 }
 0x626   :  { %1525 = vrsqrt.f32 %v974_v52  ;;  %vm984_vm11 = vweird.f32 %v974_v52 }
 0x629   :  { %v963_v54 = vpop.xlane.xlu1 %962 }
 0x62a   :  { %v971_v41 = vmul.f32 %v963_v54, %v2017_v30 }
 0x62c   :  { %v1526_v55 = vpop.eup %1525  ;;  %v975_v23 = vadd.f32 1e-05, %v971_v41 }
 0x62d   :  { %v979_v56 = vmul.f32 %v1526_v55, %v974_v52  ;;  %vm985_vm10 = vweird.f32 %v1526_v55 }
 0x62e   :  { %1527 = vrsqrt.f32 %v975_v23  ;;  %vm986_vm12 = vmor %vm984_vm11, %vm985_vm10  ;;  %vm994_vm14 = vweird.f32 %v975_v23 }
 0x62f   :  { %v980_v53 = vmul.f32 %v1526_v55, %v979_v56  ;;  %v1486_v56 = vld [vmem:[%s2165_s19] ss:$0 sm:$0xff] }
 0x631   :  { %v981_v57 = vmul.f32 0.5, %v980_v53  ;;  %v966_v58 = vpop.xlane.xlu1 %965 }
 0x632   :  { %v972_v59 = vmul.f32 %v966_v58, %v2017_v30 }
 0x633   :  { %v982_v60 = vsub.f32 1.5, %v981_v57 }
 0x634   :  { %v1528_v62 = vpop.eup %1527  ;;  %v976_v0 = vadd.f32 1e-05, %v972_v59 }
 0x635   :  { %v983_v28 = vmul.f32 %v1526_v55, %v982_v60  ;;  %v989_v2 = vmul.f32 %v1528_v62, %v975_v23  ;;  %vm995_vm13 = vweird.f32 %v1528_v62 }
 0x636   :  { %1529 = vrsqrt.f32 %v976_v0  ;;  %vm996_vm15 = vmor %vm994_vm14, %vm995_vm13  ;;  %vm1004_vm1 = vweird.f32 %v976_v0 }
 0x637   :  { %v987_v6 = vsel %vm986_vm12, %v1526_v55, %v983_v28  ;;  %v990_v7 = vmul.f32 %v1528_v62, %v989_v2 }
 0x638   :  { %v1018_v8 = vmul.f32 %v987_v6, %v950_v9 }
 0x639   :  { %v991_v11 = vmul.f32 0.5, %v990_v7  ;;  %v969_v12 = vpop.xlane.xlu0 %968 }
 0x63a   :  { %v1026_v15 = vmul.f32 %v1483_v5, %v1018_v8  ;;  %v973_v13 = vmul.f32 %v969_v12, %v2017_v30 }
 0x63b   :  { %v992_v14 = vsub.f32 1.5, %v991_v11 }
 0x63c   :  { %v1530_v16 = vpop.eup %1529  ;;  %v977_v17 = vadd.f32 1e-05, %v973_v13  ;;  %v1034_v18 = vadd.f32 %v1484_v10, %v1026_v15 }
 0x63d   :  { %v993_v19 = vmul.f32 %v1528_v62, %v992_v14  ;;  %v999_v20 = vmul.f32 %v1530_v16, %v976_v0  ;;  %vm1005_vm0 = vweird.f32 %v1530_v16 }
 0x63e   :  { %1531 = vrsqrt.f32 %v977_v17  ;;  %1432 = vmatmul.msk.f32.vlgmr.msrb.gmra.mxu0 %vm212_vm2, %v1034_v18  ;;  %vm1006_vm4 = vmor %vm1004_vm1, %vm1005_vm0  ;;  %vm1014_vm6 = vweird.f32 %v977_v17 }
 0x63f   :  { %v997_v61 = vsel %vm996_vm15, %v1528_v62, %v993_v19  ;;  %v1000_v22 = vmul.f32 %v1530_v16, %v999_v20 }
 0x640   :  { %v1019_v24 = vmul.f32 %v997_v61, %v2022_v4 }
 0x641   :  { %v1001_v63 = vmul.f32 0.5, %v1000_v22 }
 0x642   :  { %v1027_v25 = vmul.f32 %v1483_v5, %v1019_v24 }
 0x643   :  { %v1002_v26 = vsub.f32 1.5, %v1001_v63 }
 0x644   :  { %v1532_v27 = vpop.eup %1531  ;;  %v1035_v29 = vadd.f32 %v1484_v10, %v1027_v25 }
 0x645   :  { %v1003_v1 = vmul.f32 %v1530_v16, %v1002_v26  ;;  %v1009_v32 = vmul.f32 %v1532_v27, %v977_v17  ;;  %vm1015_vm5 = vweird.f32 %v1532_v27 }
 0x646   :  { %1433 = vmatmul.msk.f32.gmra.mxu0 %vm212_vm2, %v1035_v29  ;;  %vm1016_vm7 = vmor %vm1014_vm6, %vm1015_vm5 }
 0x647   :  { %v1007_v9 = vsel %vm1006_vm4, %v1530_v16, %v1003_v1  ;;  %v1010_v33 = vmul.f32 %v1532_v27, %v1009_v32 }
 0x648   :  { %v1020_v3 = vmul.f32 %v1007_v9, %v2028_v40  ;;  %v1090_v40 = vld [vmem:[%s2164_s18 + $0x8] sm:$0xff] }
 0x649   :  { %v1011_v35 = vmul.f32 0.5, %v1010_v33  ;;  %1121 = vmatpush.msrb.mxu2 %v1090_v40 }
 0x64a   :  { %v1028_v34 = vmul.f32 %v1483_v5, %v1020_v3 }
 0x64b   :  { %v1012_v36 = vsub.f32 1.5, %v1011_v35  ;;  %1122 = vmatpush.msrb.mxu2 %v1089_v44 }
 0x64c   :  { %v1036_v4 = vadd.f32 %v1484_v10, %v1028_v34 }
 0x64d   :  { %v1013_v37 = vmul.f32 %v1532_v27, %v1012_v36 }
 0x64e   :  { %1434 = vmatmul.msk.f32.gmra.mxu0 %vm212_vm2, %v1036_v4 }
 0x64f   :  { %v1017_v38 = vsel %vm1016_vm7, %v1532_v27, %v1013_v37 }
 0x650   :  { %v1021_v39 = vmul.f32 %v1017_v38, %v2034_v46 }
 0x652   :  { %v1029_v42 = vmul.f32 %v1483_v5, %v1021_v39 }
 0x654   :  { %v1037_v43 = vadd.f32 %v1484_v10, %v1029_v42 }
 0x656   :  { %1435 = vmatmul.msk.f32.gmra.mxu0 %vm212_vm2, %v1037_v43 }
 0x6bb   :  { %v1073_v21 = vpop.f32.mrf.mxu0 }
 0x6bc   :  { %v1074_v46 = vadd.f32 %v1485_v45, %v1073_v21 }
 0x6be   :  { %v1085_v48 = vmax.f32 %v1074_v46, 0.0 }
 0x6c0   :  { %1436 = vmatmul.msk.f32.vlgmr.msrb.gmra.mxu2 %vm212_vm2, %v1085_v48 }
 0x6c3   :  { %v1076_v49 = vpop.f32.mrf.mxu0 }
 0x6c4   :  { %v1077_v47 = vadd.f32 %v1485_v45, %v1076_v49 }
 0x6c6   :  { %v1086_v50 = vmax.f32 %v1077_v47, 0.0  ;;  %v1487_v47 = vld [vmem:[%s2166_s20] ss:$0 sm:$0xff]  ;;  %s1589_s20 = smov [#allocation3]  }
 0x6c8   :  { %1437 = vmatmul.msk.f32.gmra.mxu2 %vm212_vm2, %v1086_v50 }
 0x6cb   :  { %v1079_v51 = vpop.f32.mrf.mxu0 }
 0x6cc   :  { %v1080_v52 = vadd.f32 %v1485_v45, %v1079_v51 }
 0x6ce   :  { %v1087_v54 = vmax.f32 %v1080_v52, 0.0 }
 0x6d0   :  { %1438 = vmatmul.msk.f32.gmra.mxu2 %vm212_vm2, %v1087_v54  ;;  %v1488_v54 = vld [vmem:[%s2167_s21] ss:$0 sm:$0xff]  ;;  %s1373_s21 = sshll.u32 %s1589_s20, 4  ;;  %s1374_s21 = int_to_ptr.vmem [resolvable:$true] %s1373_s21 }
 0x6d3   :  { %v1082_v41 = vpop.f32.mrf.mxu0 }
 0x6d4   :  { %v1083_v55 = vadd.f32 %v1485_v45, %v1082_v41 }
 0x6d6   :  { %v1088_v23 = vmax.f32 %v1083_v55, 0.0 }
 0x6d8   :  { %1439 = vmatmul.msk.f32.gmra.mxu2 %vm212_vm2, %v1088_v23 }
 0x743   :  { %v1124_v53 = vpop.f32.mrf.mxu2 }
 0x744   :  { %v1125_v57 = vadd.f32 %v1486_v56, %v1124_v53  ;;  %v1489_v53 = vld [vmem:[%s2168_s22] ss:$0 sm:$0xff] }
 0x746   :  { %v1136_v58 = vadd.f32 %v1125_v57, %v1034_v18  ;;  %v1588_v57 = vmov 0  }
 0x747   :  { %1475 = vset.pattern.permute.xlu2 %v1588_v57  ;;  %1476 = vset.pattern.permute.xlu0 %v1588_v57 }
 0x748   :  { %v1140_v59 = vsel %vm212_vm2, %v1136_v58, 0.0 }
 0x749   :  { %1141 = vadd.xlane.f32.xlu2 %v1140_v59 }
 0x74b   :  { %v1127_v60 = vpop.f32.mrf.mxu2 }
 0x74c   :  { %v1128_v62 = vadd.f32 %v1486_v56, %v1127_v60 }
 0x74e   :  { %v1137_v0 = vadd.f32 %v1128_v62, %v1035_v29 }
 0x750   :  { %v1143_v28 = vsel %vm212_vm2, %v1137_v0, 0.0 }
 0x751   :  { %1144 = vadd.xlane.f32.xlu1 %v1143_v28 }
 0x753   :  { %v1130_v2 = vpop.f32.mrf.mxu2 }
 0x754   :  { %v1131_v5 = vadd.f32 %v1486_v56, %v1130_v2 }
 0x756   :  { %v1138_v6 = vadd.f32 %v1131_v5, %v1036_v4 }
 0x758   :  { %v1146_v7 = vsel %vm212_vm2, %v1138_v6, 0.0 }
 0x759   :  { %1147 = vadd.xlane.f32.xlu0 %v1146_v7 }
 0x75b   :  { %v1133_v8 = vpop.f32.mrf.mxu2 }
 0x75c   :  { %v1134_v10 = vadd.f32 %v1486_v56, %v1133_v8 }
 0x75e   :  { %v1139_v11 = vadd.f32 %v1134_v10, %v1037_v43 }
 0x760   :  { %v1149_v12 = vsel %vm212_vm2, %v1139_v11, 0.0 }
 0x761   :  { %1150 = vadd.xlane.f32.xlu2 %v1149_v12 }
 0x7bc   :  { %v1142_v15 = vpop.xlane.xlu2 %1141 }
 0x7bd   :  { %v1152_v13 = vmul.f32 %v1142_v15, %v2017_v30 }
 0x7bf   :  { %v1156_v14 = vsub.f32 %v1136_v58, %v1152_v13 }
 0x7c1   :  { %v1160_v16 = vmul.f32 %v1156_v14, %v1156_v14 }
 0x7c3   :  { %v1164_v17 = vsel %vm212_vm2, %v1160_v16, 0.0 }
 0x7c4   :  { %v1145_v18 = vpop.xlane.xlu1 %1144  ;;  %1165 = vadd.xlane.f32.xlu1 %v1164_v17 }
 0x7c5   :  { %v1153_v19 = vmul.f32 %v1145_v18, %v2017_v30 }
 0x7c7   :  { %v2085_v20 = vsub.f32 %v1137_v0, %v1153_v19 }
 0x7c9   :  { %v1161_v61 = vmul.f32 %v2085_v20, %v2085_v20 }
 0x7cb   :  { %v1167_v22 = vsel %vm212_vm2, %v1161_v61, 0.0 }
 0x7cc   :  { %v1148_v24 = vpop.xlane.xlu0 %1147  ;;  %1168 = vadd.xlane.f32.xlu0 %v1167_v22 }
 0x7cd   :  { %v1154_v63 = vmul.f32 %v1148_v24, %v2017_v30 }
 0x7cf   :  { %v2091_v25 = vsub.f32 %v1138_v6, %v1154_v63 }
 0x7d1   :  { %v1162_v26 = vmul.f32 %v2091_v25, %v2091_v25 }
 0x7d3   :  { %v1170_v27 = vsel %vm212_vm2, %v1162_v26, 0.0 }
 0x7d4   :  { %1171 = vadd.xlane.f32.xlu2 %v1170_v27  ;;  %v1151_v29 = vpop.xlane.xlu2 %1150 }
 0x7d5   :  { %v1155_v1 = vmul.f32 %v1151_v29, %v2017_v30 }
 0x7d7   :  { %v2097_v32 = vsub.f32 %v1139_v11, %v1155_v1 }
 0x7d9   :  { %v1163_v9 = vmul.f32 %v2097_v32, %v2097_v32 }
 0x7db   :  { %v1173_v33 = vsel %vm212_vm2, %v1163_v9, 0.0 }
 0x7dc   :  { %1174 = vadd.xlane.f32.xlu1 %v1173_v33 }
 0x837   :  { %v1166_v3 = vpop.xlane.xlu1 %1165 }
 0x838   :  { %v1176_v35 = vmul.f32 %v1166_v3, %v2017_v30 }
 0x83a   :  { %v1180_v34 = vadd.f32 1e-05, %v1176_v35 }
 0x83c   :  { %1533 = vrsqrt.f32 %v1180_v34  ;;  %vm1190_vm9 = vweird.f32 %v1180_v34 }
 0x83f   :  { %v1169_v36 = vpop.xlane.xlu0 %1168 }
 0x840   :  { %v1177_v4 = vmul.f32 %v1169_v36, %v2017_v30 }
 0x842   :  { %v1534_v37 = vpop.eup %1533  ;;  %v1181_v38 = vadd.f32 1e-05, %v1177_v4 }
 0x843   :  { %v1185_v39 = vmul.f32 %v1534_v37, %v1180_v34  ;;  %vm1191_vm8 = vweird.f32 %v1534_v37  ;;  %v1490_v34 = vld [vmem:[#allocation2] ss:$0 sm:$0xff] }
 0x844   :  { %1535 = vrsqrt.f32 %v1181_v38  ;;  %vm1192_vm3 = vmor %vm1190_vm9, %vm1191_vm8  ;;  %vm1200_vm11 = vweird.f32 %v1181_v38 }
 0x845   :  { %v1186_v42 = vmul.f32 %v1534_v37, %v1185_v39 }
 0x847   :  { %v1187_v43 = vmul.f32 0.5, %v1186_v42  ;;  %v1172_v40 = vpop.xlane.xlu2 %1171 }
 0x848   :  { %v1178_v44 = vmul.f32 %v1172_v40, %v2017_v30 }
 0x849   :  { %v1188_v45 = vsub.f32 1.5, %v1187_v43 }
 0x84a   :  { %v1536_v21 = vpop.eup %1535  ;;  %v1182_v46 = vadd.f32 1e-05, %v1178_v44 }
 0x84b   :  { %v1189_v48 = vmul.f32 %v1534_v37, %v1188_v45  ;;  %v1195_v49 = vmul.f32 %v1536_v21, %v1181_v38  ;;  %vm1201_vm10 = vweird.f32 %v1536_v21 }
 0x84c   :  { %1537 = vrsqrt.f32 %v1182_v46  ;;  %vm1202_vm12 = vmor %vm1200_vm11, %vm1201_vm10  ;;  %vm1210_vm14 = vweird.f32 %v1182_v46 }
 0x84d   :  { %v1193_v50 = vsel %vm1192_vm3, %v1534_v37, %v1189_v48  ;;  %v1196_v51 = vmul.f32 %v1536_v21, %v1195_v49 }
 0x84e   :  { %v1224_v52 = vmul.f32 %v1193_v50, %v1156_v14 }
 0x84f   :  { %v1197_v41 = vmul.f32 0.5, %v1196_v51  ;;  %v1175_v55 = vpop.xlane.xlu1 %1174 }
 0x850   :  { %v1179_v23 = vmul.f32 %v1175_v55, %v2017_v30  ;;  %v1232_v56 = vmul.f32 %v1487_v47, %v1224_v52 }
 0x851   :  { %v1198_v58 = vsub.f32 1.5, %v1197_v41 }
 0x852   :  { %v1538_v59 = vpop.eup %1537  ;;  %v1183_v60 = vadd.f32 1e-05, %v1179_v23  ;;  %v1240_v62 = vadd.f32 %v1488_v54, %v1232_v56 }
 0x853   :  { %v1199_v0 = vmul.f32 %v1536_v21, %v1198_v58  ;;  %v1205_v28 = vmul.f32 %v1538_v59, %v1182_v46  ;;  %vm1211_vm13 = vweird.f32 %v1538_v59 }
 0x854   :  { %1539 = vrsqrt.f32 %v1183_v60  ;;  %v1248_v2 = vmul.f32 %v1489_v53, %v1240_v62  ;;  %vm1212_vm15 = vmor %vm1210_vm14, %vm1211_vm13  ;;  %vm1220_vm1 = vweird.f32 %v1183_v60 }
 0x855   :  { %v1203_v30 = vsel %vm1202_vm12, %v1536_v21, %v1199_v0  ;;  %v1206_v5 = vmul.f32 %v1538_v59, %v1205_v28 }
 0x856   :  { %v1252_v6 = vsel %vm212_vm2, %v1248_v2, 0.0  ;;  %v1225_v7 = vmul.f32 %v1203_v30, %v2085_v20 }
 0x857   :  { %v1207_v8 = vmul.f32 0.5, %v1206_v5  ;;  %1253 = vadd.xlane.f32.xlu0 %v1252_v6 }
 0x858   :  { %v1233_v10 = vmul.f32 %v1487_v47, %v1225_v7 }
 0x859   :  { %v1208_v11 = vsub.f32 1.5, %v1207_v8 }
 0x85a   :  { %v1540_v12 = vpop.eup %1539  ;;  %v1241_v15 = vadd.f32 %v1488_v54, %v1233_v10 }
 0x85b   :  { %v1209_v13 = vmul.f32 %v1538_v59, %v1208_v11  ;;  %v1215_v14 = vmul.f32 %v1540_v12, %v1183_v60  ;;  %vm1221_vm0 = vweird.f32 %v1540_v12 }
 0x85c   :  { %v1249_v16 = vmul.f32 %v1489_v53, %v1241_v15  ;;  %vm1222_vm4 = vmor %vm1220_vm1, %vm1221_vm0 }
 0x85d   :  { %v1213_v17 = vsel %vm1212_vm15, %v1538_v59, %v1209_v13  ;;  %v1216_v18 = vmul.f32 %v1540_v12, %v1215_v14 }
 0x85e   :  { %v1255_v19 = vsel %vm212_vm2, %v1249_v16, 0.0  ;;  %v1226_v61 = vmul.f32 %v1213_v17, %v2091_v25 }
 0x85f   :  { %v1217_v22 = vmul.f32 0.5, %v1216_v18  ;;  %1256 = vadd.xlane.f32.xlu2 %v1255_v19  ;;  %v1356_v18 = vadd.s32 4294967288, %v1888_v31 }
 0x860   :  { %v1234_v20 = vmul.f32 %v1487_v47, %v1226_v61 }
 0x861   :  { %v1218_v24 = vsub.f32 1.5, %v1217_v22 }
 0x862   :  { %v1242_v63 = vadd.f32 %v1488_v54, %v1234_v20 }
 0x863   :  { %v1219_v26 = vmul.f32 %v1540_v12, %v1218_v24 }
 0x864   :  { %v1250_v27 = vmul.f32 %v1489_v53, %v1242_v63 }
 0x865   :  { %v1223_v29 = vsel %vm1222_vm4, %v1540_v12, %v1219_v26 }
 0x866   :  { %v1258_v1 = vsel %vm212_vm2, %v1250_v27, 0.0  ;;  %v1227_v9 = vmul.f32 %v1223_v29, %v2097_v32 }
 0x867   :  { %1259 = vadd.xlane.f32.xlu1 %v1258_v1 }
 0x868   :  { %v1235_v33 = vmul.f32 %v1487_v47, %v1227_v9 }
 0x86a   :  { %v1243_v3 = vadd.f32 %v1488_v54, %v1235_v33 }
 0x86c   :  { %v1251_v35 = vmul.f32 %v1489_v53, %v1243_v3 }
 0x86e   :  { %v1261_v25 = vsel %vm212_vm2, %v1251_v35, 0.0 }
 0x86f   :  { %1262 = vadd.xlane.f32.xlu0 %v1261_v25 }
 0x877   :  { %1268 = vperm.xlu2 %1475, %v1490_v34  }
 0x8ca   :  { %v1254_v4 = vpop.xlane.xlu0 %1253 }
 0x8d2   :  { %v1257_v36 = vpop.xlane.xlu2 %1256 }
 0x8da   :  { %v1260_v37 = vpop.xlane.xlu1 %1259  ;;  %v1269_v38 = vpop.permute.xlu2 %1268 }
 0x8db   :  { %v1271_v39 = vadd.f32 %v1269_v38, %v1254_v4  ;;  %v1272_v42 = vadd.f32 %v1269_v38, %v1257_v36  ;;  %v1273_v43 = vadd.f32 %v1269_v38, %v1260_v37 }
 0x8dd   :  { %v1440_v40 = vmul.f32 -1.442695, %v1271_v39  ;;  %v1441_v44 = vmul.f32 -1.442695, %v1272_v42  ;;  %v1442_v45 = vmul.f32 -1.442695, %v1273_v43 }
 0x8df   :  { %1541 = vpow2.f32 %v1440_v40 }
 0x8e0   :  { %1543 = vpow2.f32 %v1441_v44 }
 0x8e1   :  { %1545 = vpow2.f32 %v1442_v45 }
 0x8e2   :  { %v1263_v32 = vpop.xlane.xlu0 %1262 }
 0x8e3   :  { %v1274_v21 = vadd.f32 %v1269_v38, %v1263_v32 }
 0x8e5   :  { %v1542_v46 = vpop.eup %1541  ;;  %v1443_v48 = vmul.f32 -1.442695, %v1274_v21 }
 0x8e6   :  { %v1544_v49 = vpop.eup %1543  ;;  %v1287_v47 = vadd.f32 1.0, %v1542_v46 }
 0x8e7   :  { %v1546_v50 = vpop.eup %1545  ;;  %v1288_v51 = vadd.f32 1.0, %v1544_v49  ;;  %1547 = vpow2.f32 %v1443_v48 }
 0x8e8   :  { %v1289_v52 = vadd.f32 1.0, %v1546_v50  ;;  %1549 = vrcp.f32 %v1287_v47  ;;  %v1300_v28 = vand.u32 2147483647, %v1287_v47  ;;  %vm1296_vm5 = vweird.f32 %v1287_v47 }
 0x8e9   :  { %1551 = vrcp.f32 %v1288_v51  ;;  %v1302_v7 = vand.u32 2147483648, %v1287_v47  ;;  %v1315_v10 = vand.u32 2147483647, %v1288_v51  ;;  %v1317_v11 = vand.u32 2147483648, %v1288_v51 }
 0x8ea   :  { %1553 = vrcp.f32 %v1289_v52  ;;  %vm1311_vm8 = vweird.f32 %v1288_v51  ;;  %vm2126_vm3 = vcmp.eq.f32.partialorder %v1300_v28, 8.507059e+37  ;;  %vm1326_vm11 = vweird.f32 %v1289_v52 }
 0x8eb   :  { %v1332_v17 = vand.u32 2147483648, %v1289_v52  ;;  %v1330_v20 = vand.u32 2147483647, %v1289_v52  ;;  %v1303_v63 = vor.u32 1.1754944e-38, %v1302_v7  ;;  %vm1316_vm12 = vcmp.eq.f32.partialorder %v1315_v10, 8.507059e+37 }
 0x8ec   :  { %v1318_v26 = vor.u32 1.1754944e-38, %v1317_v11 }
 0x8ed   :  { %v1548_v54 = vpop.eup %1547  ;;  %v1333_v3 = vor.u32 1.1754944e-38, %v1332_v17  ;;  %vm1331_vm0 = vcmp.eq.f32.partialorder %v1330_v20, 8.507059e+37 }
 0x8ee   :  { %v1550_v41 = vpop.eup %1549  ;;  %v1290_v55 = vadd.f32 1.0, %v1548_v54 }
 0x8ef   :  { %v1552_v23 = vpop.eup %1551  ;;  %v1292_v56 = vmul.f32 %v1550_v41, %v1287_v47  ;;  %vm1297_vm2 = vweird.f32 %v1550_v41 }
 0x8f0   :  { %v1554_v53 = vpop.eup %1553  ;;  %v1307_v57 = vmul.f32 %v1552_v23, %v1288_v51  ;;  %1555 = vrcp.f32 %v1290_v55  ;;  %vm1312_vm6 = vweird.f32 %v1552_v23  ;;  %vm2122_vm7 = vmor %vm1296_vm5, %vm1297_vm2  ;;  %v1347_v24 = vand.u32 2147483648, %v1290_v55 }
 0x8f1   :  { %v1293_v58 = vsub.f32 1.0, %v1292_v56  ;;  %v1322_v59 = vmul.f32 %v1554_v53, %v1289_v52  ;;  %vm1327_vm9 = vweird.f32 %v1554_v53  ;;  %vm2130_vm10 = vmor %vm1311_vm8, %vm1312_vm6  ;;  %v1345_v1 = vand.u32 2147483647, %v1290_v55 }
 0x8f2   :  { %v1308_v60 = vsub.f32 1.0, %v1307_v57  ;;  %vm1328_vm13 = vmor %vm1326_vm11, %vm1327_vm9  ;;  %vm1341_vm15 = vweird.f32 %v1290_v55  ;;  %v1348_v25 = vor.u32 1.1754944e-38, %v1347_v24  ;;  %vm1358_vm2 = vcmask 130112  }
 0x8f3   :  { %v1323_v62 = vsub.f32 1.0, %v1322_v59  ;;  %v1294_v0 = vmul.f32 %v1550_v41, %v1293_v58  ;;  %vm1346_vm4 = vcmp.eq.f32.partialorder %v1345_v1, 8.507059e+37  ;;  %vm1363_vm5 = vcmask 1041409  }
 0x8f4   :  { %v1309_v2 = vmul.f32 %v1552_v23, %v1308_v60  ;;  %vm1366_vm6 = vcmask 123904  }
 0x8f5   :  { %v1295_v30 = vadd.f32 %v1550_v41, %v1294_v0  ;;  %v1324_v5 = vmul.f32 %v1554_v53, %v1323_v62 }
 0x8f6   :  { %v1556_v6 = vpop.eup %1555  ;;  %v1310_v8 = vadd.f32 %v1552_v23, %v1309_v2 }
 0x8f7   :  { %v1337_v12 = vmul.f32 %v1556_v6, %v1290_v55  ;;  %v1325_v13 = vadd.f32 %v1554_v53, %v1324_v5  ;;  %v1299_v61 = vsel %vm2122_vm7, %v1550_v41, %v1295_v30  ;;  %vm1342_vm14 = vweird.f32 %v1556_v6 }
 0x8f8   :  { %v1314_v22 = vsel %vm2130_vm10, %v1552_v23, %v1310_v8  ;;  %v1304_v9 = vsel %vm2126_vm3, %v1303_v63, %v1299_v61  ;;  %vm1343_vm1 = vmor %vm1341_vm15, %vm1342_vm14 }
 0x8f9   :  { %v1338_v19 = vsub.f32 1.0, %v1337_v12  ;;  %v1329_v29 = vsel %vm1328_vm13, %v1554_v53, %v1325_v13  ;;  %v1319_v33 = vsel %vm1316_vm12, %v1318_v26, %v1314_v22  ;;  %v1355_v4 = vperm.slane %v1304_v9, %v1888_v31 }
 0x8fa   :  { %v1334_v34 = vsel %vm1331_vm0, %v1333_v3, %v1329_v29  ;;  %v1357_v37 = vperm.slane %v1319_v33, %v1356_v18 }
 0x8fb   :  { %v1339_v27 = vmul.f32 %v1556_v6, %v1338_v19  ;;  %v1360_v39 = vperm.slane %v1334_v34, %v1888_v31 }
 0x8fc   :  { %v1359_v43 = vsel %vm1358_vm2, %v1357_v37, %v1355_v4 }
 0x8fd   :  { %v1340_v35 = vadd.f32 %v1556_v6, %v1339_v27 }
 0x8ff   :  { %v1344_v36 = vsel %vm1343_vm1, %v1556_v6, %v1340_v35 }
 0x900   :  { %v1349_v38 = vsel %vm1346_vm4, %v1348_v25, %v1344_v36 }
 0x901   :  { %v1361_v42 = vperm.slane %v1349_v38, %v1356_v18 }
 0x903   :  { %v1362_v40 = vsel %vm1358_vm2, %v1361_v42, %v1360_v39 }
 0x904   :  { %v1364_v44 = vsel %vm1363_vm5, %v1362_v40, %v1359_v43 }
 0x905   :  { %1367 = vst.msk [vmem:[#allocation3] sm:$0x3] %vm1366_vm6, %v1364_v44 }
 0x906   :  { %1378 = dma.vmem_to_hbm [thread:$0]  %s1374_s21, 32, %s1376_s23, [#allocation4]  }
 0x907   :  { %1581 = dma.done.wait [#allocation4], 32  }
 0x908   :  { %1582 = vsyncadd [#allocation4], 4294967264 }
 0x909   :  { %1383 = vsyncpa [#allocation4], 1 }

</bundles_post_ra>
